<compile_context>
chip_gen: v7x
topology: tpu7x:2x2x1
jax: 0.10.0
libtpu: 0.0.40
codegen_flags: <defaults>
</compile_context>

<pallas_src>
import functools
import math

import jax
import jax.numpy as jnp
from jax.experimental import pallas as pl
from jax.experimental.pallas import tpu as pltpu

CFG = dict(
    vocab_size=256,
    context_length=16,
    emb_dim=128,
    n_heads=4,
    n_layers=2,
    emb_drop_rate=0.0,
    attn_drop_rate=0.0,
    res_drop_rate=0.0,
    qkv_bias=False,
)

_NEG_BIG = jnp.float32(-1e30)          # finite additive causal mask value
_GELU_C = math.sqrt(2.0 / math.pi)     # tanh-approx GELU constant


# ------------------------- in-kernel helpers -------------------------

def _layernorm(x, g, b, eps=1e-5):
    # single-pass LN: mean and E[x^2] together, var = E[x^2] - mean^2
    # (slightly less stable than two-pass; fine for normalized activations, eps=1e-5)
    mean = jnp.mean(x, axis=-1, keepdims=True)
    m2 = jnp.mean(x * x, axis=-1, keepdims=True)
    var = m2 - mean * mean
    return (x - mean) * jax.lax.rsqrt(var + eps) * g + b


def _gelu(x):
    # tanh-approximation GELU (matches the reference model)
    return 0.5 * x * (1.0 + jnp.tanh(_GELU_C * (x + 0.044715 * x ** 3)))


# ------------------------- fused Pallas kernel -------------------------

def gpt_fused_kernel(x_ref, mask_ref,
                     vec_ref, wqkv_ref, wo_ref, w1_ref, b1_ref, w2_ref,
                     fin_ref, wout_ref,
                     logits_ref,
                     acc_ref,
                     *, n_heads, seq):
    """One grid step == (one batch element, one transformer layer).

    x_ref      : (S, E)    f32   token+pos embeddings for this batch element
    mask_ref   : (S, S)    f32   additive causal mask (0 / -1e30)
    vec_ref    : (6, E)    f32   packed [ln1_g, ln1_b, bo, ln2_g, ln2_b, b2]
    wqkv_ref   : (E, 3E)   bf16  fused QKV weights (q columns pre-scaled by 1/sqrt(Dh))
    wo_ref     : (E, E)    bf16  attention output projection
    w1_ref     : (E, 4E)   bf16  FFN up-projection     b1_ref : (1, 4E) f32
    w2_ref     : (4E, E)   bf16  FFN down-projection
    fin_ref    : (2, E)    f32   packed [final_g, final_b]
    wout_ref   : (E, V)    bf16  LM head
    logits_ref : (S, V)    f32   written only at the last layer
    acc_ref    : (S, E)    f32   VMEM scratch carrying the residual stream
    """
    layer = pl.program_id(1)
    n_layers = pl.num_programs(1)

    @pl.when(layer == 0)
    def _():
        acc_ref[...] = x_ref[...].astype(jnp.float32)

    x = acc_ref[...]                              # (S, E) f32 residual stream
    S, E = x.shape
    dh = E // n_heads
    mm_dt = wqkv_ref.dtype                        # bf16 matmul-operand dtype

    vec = vec_ref[...]                            # (6, E) f32
    ln1_g, ln1_b = vec[0:1], vec[1:2]
    bo = vec[2:3]
    ln2_g, ln2_b = vec[3:4], vec[4:5]
    b2 = vec[5:6]

    # ---------------- attention sub-block ----------------
    h = _layernorm(x, ln1_g, ln1_b)
    qkv = jnp.dot(h.astype(mm_dt), wqkv_ref[...],
                  preferred_element_type=jnp.float32)        # (S, 3E) f32
    qkv_b = qkv.astype(mm_dt)                                # cast once for MXU

    def heads(t):                                            # (S, E) -> (H, S, Dh)
        return t.reshape(seq, n_heads, dh).transpose(1, 0, 2)

    qh = heads(qkv_b[:, :E])          # 1/sqrt(Dh) already folded into Wq
    kh = heads(qkv_b[:, E:2 * E])
    vh = heads(qkv_b[:, 2 * E:])

    # single head-batched score/context pair (2 MXU pushes instead of 2*H)
    s = jnp.einsum('hqd,hkd->hqk', qh, kh,
                   preferred_element_type=jnp.float32) + mask_ref[...][None]
    s = s - jnp.max(s, axis=-1, keepdims=True)               # keep: makes -1e30 mask safe
    p = jnp.exp(s)
    p = p * pl.reciprocal(jnp.sum(p, axis=-1, keepdims=True), approx=True)
    ctx = jnp.einsum('hqk,hkd->hqd', p.astype(mm_dt), vh,
                     preferred_element_type=jnp.float32)     # (H, S, Dh) f32
    ctx = ctx.transpose(1, 0, 2).reshape(seq, E)             # (S, E)

    attn_out = jnp.dot(ctx.astype(mm_dt), wo_ref[...],
                       preferred_element_type=jnp.float32) + bo
    x = x + attn_out                                          # res dropout = identity

    # ---------------- feed-forward sub-block ----------------
    h = _layernorm(x, ln2_g, ln2_b)
    h1 = _gelu(jnp.dot(h.astype(mm_dt), w1_ref[...],
                       preferred_element_type=jnp.float32) + b1_ref[...])
    h2 = jnp.dot(h1.astype(mm_dt), w2_ref[...],
                 preferred_element_type=jnp.float32) + b2
    x = x + h2                                                # res dropout = identity

    acc_ref[...] = x                                          # carry to next layer

    # ---------------- final LayerNorm + LM head (fused, last layer only) --------
    @pl.when(layer == n_layers - 1)
    def _():
        fin = fin_ref[...]                                    # (2, E) [gamma; beta]
        hf = _layernorm(x, fin[0:1], fin[1:2])
        logits_ref[...] = jnp.dot(hf.astype(wout_ref.dtype), wout_ref[...],
                                  preferred_element_type=jnp.float32
                                  ).astype(logits_ref.dtype)


# ------------------------- wrapper -------------------------

def _layer_spec(*shape):
    """One layer slice of a (n_layers, *shape) stacked param; grid = (batch, layer)."""
    nz = (0,) * len(shape)
    return pl.BlockSpec((None,) + tuple(shape), lambda b, l, _z=nz: (l,) + _z)


def _const_spec(*shape):
    """Input whose block index never changes over the (batch, layer) grid."""
    nz = (0,) * len(shape)
    return pl.BlockSpec(tuple(shape), lambda b, l, _z=nz: _z)


def gpt_forward(in_idx, params, n_heads=CFG['n_heads']):
    B, S = in_idx.shape
    E = params['tok_emb'].shape[1]
    V = params['w_out'].shape[1]
    L = params['wqkv'].shape[0]
    H4 = params['w1'].shape[2]

    # glue: embedding gathers + positional add in plain JAX (emb dropout = identity)
    tok = jnp.take(params['tok_emb'], in_idx, axis=0)            # (B, S, E)
    pos = params['pos_emb'][:S][None, :, :]                      # (1, S, E)
    x = (tok + pos).astype(jnp.float32).reshape(B * S, E)        # batch-major rows

    # additive causal mask: 0 on/below diagonal, -1e30 above (no -inf arithmetic)
    idx = jnp.arange(S)
    mask = jnp.where(idx[None, :] > idx[:, None], _NEG_BIG, jnp.float32(0.0))

    kernel = functools.partial(gpt_fused_kernel, n_heads=n_heads, seq=S)

    logits = pl.pallas_call(
        kernel,
        out_shape=jax.ShapeDtypeStruct((B * S, V), jnp.float32),
        grid_spec=pltpu.PrefetchScalarGridSpec(
            num_scalar_prefetch=0,
            grid=(B, L),                                   # batch parallel, layer sequential
            in_specs=[
                pl.BlockSpec((S, E), lambda b, l: (b, 0)),     # residual-stream init
                _const_spec(S, S),                             # additive causal mask
                _layer_spec(6, E),                             # [ln1_g,ln1_b,bo,ln2_g,ln2_b,b2]
                _layer_spec(E, 3 * E),                         # Wqkv (q cols pre-scaled)
                _layer_spec(E, E),                             # Wo
                _layer_spec(E, H4),                            # FFN W1
                _layer_spec(1, H4),                            # FFN b1
                _layer_spec(H4, E),                            # FFN W2
                _const_spec(2, E),                             # [final_g, final_b]
                _const_spec(E, V),                             # LM head W_out
            ],
            out_specs=pl.BlockSpec((S, V), lambda b, l: (b, 0)),   # written at last layer only
            scratch_shapes=[pltpu.VMEM((S, E), jnp.float32)],      # resident residual stream
        ),
        compiler_params=pltpu.CompilerParams(
            dimension_semantics=("parallel", "arbitrary")),    # batch // (2nd TC on v7x)
    )(x, mask,
      params['vec6'], params['wqkv'], params['wo'], params['w1'],
      params['b1'], params['w2'], params['fin'], params['w_out'])

    return logits.reshape(B, S, V)


# ------------------------- deterministic params -------------------------

def init_params(key, cfg):
    E, V, C = cfg['emb_dim'], cfg['vocab_size'], cfg['context_length']
    L, H = cfg['n_layers'], cfg['n_heads']
    H4 = 4 * E
    dh = E // H
    wdt = jnp.bfloat16   # matmul-operand dtype (MXU-native); f32 accumulation

    def nrm(k, shape, std=0.02):
        return (std * jax.random.normal(k, shape)).astype(jnp.float32)

    keys = jax.random.split(key, 10)

    # fused QKV weights; fold 1/sqrt(Dh) into the Q columns (one-time weight fold)
    wqkv = nrm(keys[3], (L, E, 3 * E))
    wqkv = wqkv.at[:, :, :E].multiply(1.0 / math.sqrt(dh))

    ones = jnp.ones((L, 1, E), jnp.float32)
    zeros = jnp.zeros((L, 1, E), jnp.float32)
    bo = nrm(keys[8], (L, 1, E))
    b2 = nrm(keys[9], (L, 1, E))
    # packed per-layer vectors: [ln1_g, ln1_b, bo, ln2_g, ln2_b, b2] -> (L, 6, E)
    vec6 = jnp.concatenate([ones, zeros, bo, ones, zeros, b2], axis=1)

    # packed final LN params: [gamma; beta] -> (2, E)
    fin = jnp.concatenate([jnp.ones((1, E), jnp.float32),
                           jnp.zeros((1, E), jnp.float32)], axis=0)

    params = dict(
        tok_emb=nrm(keys[0], (V, E)),
        pos_emb=nrm(keys[1], (C, E)),
        w_out=nrm(keys[2], (E, V)).astype(wdt),
        fin=fin,
        # per-layer weights stacked along a leading layer axis
        vec6=vec6,
        wqkv=wqkv.astype(wdt),
        wo=nrm(keys[4], (L, E, E)).astype(wdt),
        w1=nrm(keys[5], (L, E, H4)).astype(wdt),
        b1=nrm(keys[6], (L, 1, H4)),
        w2=nrm(keys[7], (L, H4, E)).astype(wdt),
    )
    return params


if __name__ == "__main__":
    key = jax.random.PRNGKey(0)
    pkey, ikey = jax.random.split(key)
    params = init_params(pkey, CFG)

    B, S = 2, CFG['context_length']   # batch=2, seq=16
    in_idx = jax.random.randint(ikey, (B, S), 0, CFG['vocab_size'],
                                dtype=jnp.int32)

    fwd = jax.jit(gpt_forward)
    logits = jax.block_until_ready(fwd(in_idx, params))

    assert logits.shape == (B, S, CFG['vocab_size'])
    assert logits.dtype == jnp.float32
    assert bool(jnp.all(jnp.isfinite(logits)))
    print("KERNEL_OK")
</pallas_src>

<mosaic_0001>
module attributes {stable_mosaic.version = 11 : i64} {
  func.func @gpt_fused_kernel(%arg0: i32, %arg1: i32, %arg2: memref<16x128xf32, #tpu.memory_space<vmem>>, %arg3: memref<16x16xf32, #tpu.memory_space<vmem>>, %arg4: memref<1x6x128xf32, #tpu.memory_space<vmem>>, %arg5: memref<1x128x384xbf16, #tpu.memory_space<vmem>>, %arg6: memref<1x128x128xbf16, #tpu.memory_space<vmem>>, %arg7: memref<1x128x512xbf16, #tpu.memory_space<vmem>>, %arg8: memref<1x1x512xf32, #tpu.memory_space<vmem>>, %arg9: memref<1x512x128xbf16, #tpu.memory_space<vmem>>, %arg10: memref<2x128xf32, #tpu.memory_space<vmem>>, %arg11: memref<128x256xbf16, #tpu.memory_space<vmem>>, %arg12: memref<16x256xf32, #tpu.memory_space<vmem>>, %arg13: memref<16x128xf32, #tpu.memory_space<vmem>>) attributes {dimension_semantics = [#tpu.dimension_semantics<parallel>, #tpu.dimension_semantics<arbitrary>], iteration_bounds = array<i64: 2, 2>, scalar_prefetch = 0 : i64, scratch_operands = 1 : i64, tpu.core_type = #tpu.core_type<tc>, window_params = [{transform_indices = @transform_0, window_bounds = array<i64: 16, 128>}, {pipeline_mode = #tpu.pipeline_mode<synchronous>, transform_indices = @transform_1, window_bounds = array<i64: 16, 16>}, {transform_indices = @transform_2, window_bounds = array<i64: 1, 6, 128>}, {transform_indices = @transform_3, window_bounds = array<i64: 1, 128, 384>}, {transform_indices = @transform_4, window_bounds = array<i64: 1, 128, 128>}, {transform_indices = @transform_5, window_bounds = array<i64: 1, 128, 512>}, {transform_indices = @transform_6, window_bounds = array<i64: 1, 1, 512>}, {transform_indices = @transform_7, window_bounds = array<i64: 1, 512, 128>}, {pipeline_mode = #tpu.pipeline_mode<synchronous>, transform_indices = @transform_8, window_bounds = array<i64: 2, 128>}, {pipeline_mode = #tpu.pipeline_mode<synchronous>, transform_indices = @transform_9, window_bounds = array<i64: 128, 256>}, {transform_indices = @transform_10, window_bounds = array<i64: 16, 256>}]} {
    %c0_i32 = arith.constant 0 : i32
    %0 = arith.cmpi eq, %arg1, %c0_i32 : i32
    %1 = arith.extui %0 : i1 to i32
    %c0_i32_0 = arith.constant 0 : i32
    %2 = arith.cmpi ne, %1, %c0_i32_0 : i32
    scf.if %2 {
      %c0_46 = arith.constant 0 : index
      %c0_47 = arith.constant 0 : index
      %128 = vector.load %arg2[%c0_46, %c0_47] : memref<16x128xf32, #tpu.memory_space<vmem>>, vector<16x128xf32>
      %c0_48 = arith.constant 0 : index
      %c0_49 = arith.constant 0 : index
      %129 = vector.load %arg13[%c0_48, %c0_49] : memref<16x128xf32, #tpu.memory_space<vmem>>, vector<16x128xf32>
      tpu.vector_store %arg13[%c0_48, %c0_49], %128 {strides = array<i32>} : memref<16x128xf32, #tpu.memory_space<vmem>>, vector<16x128xf32>,
    } else {
    }
    %c0 = arith.constant 0 : index
    %c0_1 = arith.constant 0 : index
    %3 = vector.load %arg13[%c0, %c0_1] : memref<16x128xf32, #tpu.memory_space<vmem>>, vector<16x128xf32>
    %c0_2 = arith.constant 0 : index
    %c0_3 = arith.constant 0 : index
    %c0_4 = arith.constant 0 : index
    %4 = vector.load %arg4[%c0_2, %c0_3, %c0_4] : memref<1x6x128xf32, #tpu.memory_space<vmem>>, vector<1x6x128xf32>
    %5 = vector.shape_cast %4 : vector<1x6x128xf32> to vector<6x128xf32>
    %6 = vector.extract_strided_slice %5 {offsets = [0, 0], sizes = [1, 128], strides = [1, 1]} : vector<6x128xf32> to vector<1x128xf32>
    %7 = vector.extract_strided_slice %5 {offsets = [1, 0], sizes = [1, 128], strides = [1, 1]} : vector<6x128xf32> to vector<1x128xf32>
    %8 = vector.extract_strided_slice %5 {offsets = [2, 0], sizes = [1, 128], strides = [1, 1]} : vector<6x128xf32> to vector<1x128xf32>
    %9 = vector.extract_strided_slice %5 {offsets = [3, 0], sizes = [1, 128], strides = [1, 1]} : vector<6x128xf32> to vector<1x128xf32>
    %10 = vector.extract_strided_slice %5 {offsets = [4, 0], sizes = [1, 128], strides = [1, 1]} : vector<6x128xf32> to vector<1x128xf32>
    %11 = vector.extract_strided_slice %5 {offsets = [5, 0], sizes = [1, 128], strides = [1, 1]} : vector<6x128xf32> to vector<1x128xf32>
    %cst = arith.constant dense<0.000000e+00> : vector<16xf32>
    %12 = vector.multi_reduction <add>, %3, %cst [1] : vector<16x128xf32> to vector<16xf32>
    %13 = vector.shape_cast %12 : vector<16xf32> to vector<16x1xf32>
    %cst_5 = arith.constant 1.280000e+02 : f32
    %14 = vector.broadcast %cst_5 : f32 to vector<16x1xf32>
    %15 = arith.divf %13, %14 : vector<16x1xf32>
    %16 = arith.mulf %3, %3 : vector<16x128xf32>
    %cst_6 = arith.constant dense<0.000000e+00> : vector<16xf32>
    %17 = vector.multi_reduction <add>, %16, %cst_6 [1] : vector<16x128xf32> to vector<16xf32>
    %18 = vector.shape_cast %17 : vector<16xf32> to vector<16x1xf32>
    %cst_7 = arith.constant 1.280000e+02 : f32
    %19 = vector.broadcast %cst_7 : f32 to vector<16x1xf32>
    %20 = arith.divf %18, %19 : vector<16x1xf32>
    %21 = arith.mulf %15, %15 : vector<16x1xf32>
    %22 = arith.subf %20, %21 : vector<16x1xf32>
    %23 = vector.broadcast %15 : vector<16x1xf32> to vector<16x128xf32>
    %24 = arith.subf %3, %23 : vector<16x128xf32>
    %cst_8 = arith.constant 9.99999974E-6 : f32
    %25 = vector.broadcast %cst_8 : f32 to vector<16x1xf32>
    %26 = arith.addf %22, %25 : vector<16x1xf32>
    %27 = math.rsqrt %26 : vector<16x1xf32>
    %28 = vector.broadcast %27 : vector<16x1xf32> to vector<16x128xf32>
    %29 = arith.mulf %24, %28 : vector<16x128xf32>
    %30 = vector.broadcast %6 : vector<1x128xf32> to vector<16x128xf32>
    %31 = arith.mulf %29, %30 : vector<16x128xf32>
    %32 = vector.broadcast %7 : vector<1x128xf32> to vector<16x128xf32>
    %33 = arith.addf %31, %32 : vector<16x128xf32>
    %34 = arith.truncf %33 : vector<16x128xf32> to vector<16x128xbf16>
    %c0_9 = arith.constant 0 : index
    %c0_10 = arith.constant 0 : index
    %c0_11 = arith.constant 0 : index
    %35 = vector.load %arg5[%c0_9, %c0_10, %c0_11] : memref<1x128x384xbf16, #tpu.memory_space<vmem>>, vector<1x128x384xbf16>
    %36 = vector.shape_cast %35 : vector<1x128x384xbf16> to vector<128x384xbf16>
    %cst_12 = arith.constant dense<0.000000e+00> : vector<16x384xf32>
    %37 = tpu.matmul %34, %36, %cst_12 {dimension_numbers = #tpu.dot_dimension_numbers<[1], [0], [0], [1], [0, 0, 1, 1], [], []>} : vector<16x128xbf16>, vector<128x384xbf16>, vector<16x384xf32> -> vector<16x384xf32>
    %38 = arith.truncf %37 : vector<16x384xf32> to vector<16x384xbf16>
    %39 = vector.extract_strided_slice %38 {offsets = [0, 0], sizes = [16, 128], strides = [1, 1]} : vector<16x384xbf16> to vector<16x128xbf16>
    %40 = vector.shape_cast %39 : vector<16x128xbf16> to vector<16x4x32xbf16>
    %41 = tpu.transpose %40, [1, 0, 2] : vector<16x4x32xbf16> -> vector<4x16x32xbf16>
    %42 = vector.extract_strided_slice %38 {offsets = [0, 128], sizes = [16, 128], strides = [1, 1]} : vector<16x384xbf16> to vector<16x128xbf16>
    %43 = vector.shape_cast %42 : vector<16x128xbf16> to vector<16x4x32xbf16>
    %44 = tpu.transpose %43, [1, 0, 2] : vector<16x4x32xbf16> -> vector<4x16x32xbf16>
    %45 = vector.extract_strided_slice %38 {offsets = [0, 256], sizes = [16, 128], strides = [1, 1]} : vector<16x384xbf16> to vector<16x128xbf16>
    %46 = vector.shape_cast %45 : vector<16x128xbf16> to vector<16x4x32xbf16>
    %47 = tpu.transpose %46, [1, 0, 2] : vector<16x4x32xbf16> -> vector<4x16x32xbf16>
    "tpu.trace_start"() <{level = 10 : i32, message = "hqd,hkd->hqk"}> : () -> ()
    %cst_13 = arith.constant dense<0.000000e+00> : vector<4x16x16xf32>
    %48 = tpu.matmul %41, %44, %cst_13 {dimension_numbers = #tpu.dot_dimension_numbers<[2], [2], [1], [1], [0, 0, 0, 1, 1, 1], [0], [0]>} : vector<4x16x32xbf16>, vector<4x16x32xbf16>, vector<4x16x16xf32> -> vector<4x16x16xf32>
    "tpu.trace_stop"() : () -> ()
    %c0_14 = arith.constant 0 : index
    %c0_15 = arith.constant 0 : index
    %49 = vector.load %arg3[%c0_14, %c0_15] : memref<16x16xf32, #tpu.memory_space<vmem>>, vector<16x16xf32>
    %50 = vector.shape_cast %49 : vector<16x16xf32> to vector<1x16x16xf32>
    %51 = vector.broadcast %50 : vector<1x16x16xf32> to vector<4x16x16xf32>
    %52 = arith.addf %48, %51 : vector<4x16x16xf32>
    %cst_16 = arith.constant dense<0xFF800000> : vector<4x16xf32>
    %53 = vector.multi_reduction <maximumf>, %52, %cst_16 [2] : vector<4x16x16xf32> to vector<4x16xf32>
    %54 = vector.shape_cast %53 : vector<4x16xf32> to vector<4x16x1xf32>
    %55 = vector.broadcast %54 : vector<4x16x1xf32> to vector<4x16x16xf32>
    %56 = arith.subf %52, %55 : vector<4x16x16xf32>
    %57 = math.exp %56 : vector<4x16x16xf32>
    %cst_17 = arith.constant dense<0.000000e+00> : vector<4x16xf32>
    %58 = vector.multi_reduction <add>, %57, %cst_17 [2] : vector<4x16x16xf32> to vector<4x16xf32>
    %59 = vector.shape_cast %58 : vector<4x16xf32> to vector<4x16x1xf32>
    %60 = tpu.reciprocal %59 {approx = true} : vector<4x16x1xf32> -> vector<4x16x1xf32>
    %61 = vector.broadcast %60 : vector<4x16x1xf32> to vector<4x16x16xf32>
    %62 = arith.mulf %57, %61 : vector<4x16x16xf32>
    %63 = arith.truncf %62 : vector<4x16x16xf32> to vector<4x16x16xbf16>
    "tpu.trace_start"() <{level = 10 : i32, message = "hqk,hkd->hqd"}> : () -> ()
    %cst_18 = arith.constant dense<0.000000e+00> : vector<4x16x32xf32>
    %64 = tpu.matmul %63, %47, %cst_18 {dimension_numbers = #tpu.dot_dimension_numbers<[2], [1], [1], [2], [0, 0, 0, 1, 1, 2], [0], [0]>} : vector<4x16x16xbf16>, vector<4x16x32xbf16>, vector<4x16x32xf32> -> vector<4x16x32xf32>
    "tpu.trace_stop"() : () -> ()
    %65 = tpu.transpose %64, [1, 0, 2] : vector<4x16x32xf32> -> vector<16x4x32xf32>
    %66 = vector.shape_cast %65 : vector<16x4x32xf32> to vector<16x128xf32>
    %67 = arith.truncf %66 : vector<16x128xf32> to vector<16x128xbf16>
    %c0_19 = arith.constant 0 : index
    %c0_20 = arith.constant 0 : index
    %c0_21 = arith.constant 0 : index
    %68 = vector.load %arg6[%c0_19, %c0_20, %c0_21] : memref<1x128x128xbf16, #tpu.memory_space<vmem>>, vector<1x128x128xbf16>
    %69 = vector.shape_cast %68 : vector<1x128x128xbf16> to vector<128x128xbf16>
    %cst_22 = arith.constant dense<0.000000e+00> : vector<16x128xf32>
    %70 = tpu.matmul %67, %69, %cst_22 {dimension_numbers = #tpu.dot_dimension_numbers<[1], [0], [0], [1], [0, 0, 1, 1], [], []>} : vector<16x128xbf16>, vector<128x128xbf16>, vector<16x128xf32> -> vector<16x128xf32>
    %71 = vector.broadcast %8 : vector<1x128xf32> to vector<16x128xf32>
    %72 = arith.addf %70, %71 : vector<16x128xf32>
    %73 = arith.addf %3, %72 : vector<16x128xf32>
    %cst_23 = arith.constant dense<0.000000e+00> : vector<16xf32>
    %74 = vector.multi_reduction <add>, %73, %cst_23 [1] : vector<16x128xf32> to vector<16xf32>
    %75 = vector.shape_cast %74 : vector<16xf32> to vector<16x1xf32>
    %cst_24 = arith.constant 1.280000e+02 : f32
    %76 = vector.broadcast %cst_24 : f32 to vector<16x1xf32>
    %77 = arith.divf %75, %76 : vector<16x1xf32>
    %78 = arith.mulf %73, %73 : vector<16x128xf32>
    %cst_25 = arith.constant dense<0.000000e+00> : vector<16xf32>
    %79 = vector.multi_reduction <add>, %78, %cst_25 [1] : vector<16x128xf32> to vector<16xf32>
    %80 = vector.shape_cast %79 : vector<16xf32> to vector<16x1xf32>
    %cst_26 = arith.constant 1.280000e+02 : f32
    %81 = vector.broadcast %cst_26 : f32 to vector<16x1xf32>
    %82 = arith.divf %80, %81 : vector<16x1xf32>
    %83 = arith.mulf %77, %77 : vector<16x1xf32>
    %84 = arith.subf %82, %83 : vector<16x1xf32>
    %85 = vector.broadcast %77 : vector<16x1xf32> to vector<16x128xf32>
    %86 = arith.subf %73, %85 : vector<16x128xf32>
    %cst_27 = arith.constant 9.99999974E-6 : f32
    %87 = vector.broadcast %cst_27 : f32 to vector<16x1xf32>
    %88 = arith.addf %84, %87 : vector<16x1xf32>
    %89 = math.rsqrt %88 : vector<16x1xf32>
    %90 = vector.broadcast %89 : vector<16x1xf32> to vector<16x128xf32>
    %91 = arith.mulf %86, %90 : vector<16x128xf32>
    %92 = vector.broadcast %9 : vector<1x128xf32> to vector<16x128xf32>
    %93 = arith.mulf %91, %92 : vector<16x128xf32>
    %94 = vector.broadcast %10 : vector<1x128xf32> to vector<16x128xf32>
    %95 = arith.addf %93, %94 : vector<16x128xf32>
    %96 = arith.truncf %95 : vector<16x128xf32> to vector<16x128xbf16>
    %c0_28 = arith.constant 0 : index
    %c0_29 = arith.constant 0 : index
    %c0_30 = arith.constant 0 : index
    %97 = vector.load %arg7[%c0_28, %c0_29, %c0_30] : memref<1x128x512xbf16, #tpu.memory_space<vmem>>, vector<1x128x512xbf16>
    %98 = vector.shape_cast %97 : vector<1x128x512xbf16> to vector<128x512xbf16>
    %cst_31 = arith.constant dense<0.000000e+00> : vector<16x512xf32>
    %99 = tpu.matmul %96, %98, %cst_31 {dimension_numbers = #tpu.dot_dimension_numbers<[1], [0], [0], [1], [0, 0, 1, 1], [], []>} : vector<16x128xbf16>, vector<128x512xbf16>, vector<16x512xf32> -> vector<16x512xf32>
    %c0_32 = arith.constant 0 : index
    %c0_33 = arith.constant 0 : index
    %c0_34 = arith.constant 0 : index
    %100 = vector.load %arg8[%c0_32, %c0_33, %c0_34] : memref<1x1x512xf32, #tpu.memory_space<vmem>>, vector<1x1x512xf32>
    %101 = vector.shape_cast %100 : vector<1x1x512xf32> to vector<1x512xf32>
    %102 = vector.broadcast %101 : vector<1x512xf32> to vector<16x512xf32>
    %103 = arith.addf %99, %102 : vector<16x512xf32>
    %cst_35 = arith.constant 5.000000e-01 : f32
    %104 = vector.broadcast %cst_35 : f32 to vector<16x512xf32>
    %105 = arith.mulf %104, %103 : vector<16x512xf32>
    %106 = arith.mulf %103, %103 : vector<16x512xf32>
    %107 = arith.mulf %103, %106 : vector<16x512xf32>
    %cst_36 = arith.constant 4.471500e-02 : f32
    %108 = vector.broadcast %cst_36 : f32 to vector<16x512xf32>
    %109 = arith.mulf %108, %107 : vector<16x512xf32>
    %110 = arith.addf %103, %109 : vector<16x512xf32>
    %cst_37 = arith.constant 0.797884583 : f32
    %111 = vector.broadcast %cst_37 : f32 to vector<16x512xf32>
    %112 = arith.mulf %111, %110 : vector<16x512xf32>
    %113 = math.tanh %112 : vector<16x512xf32>
    %cst_38 = arith.constant 1.000000e+00 : f32
    %114 = vector.broadcast %cst_38 : f32 to vector<16x512xf32>
    %115 = arith.addf %114, %113 : vector<16x512xf32>
    %116 = arith.mulf %105, %115 : vector<16x512xf32>
    %117 = arith.truncf %116 : vector<16x512xf32> to vector<16x512xbf16>
    %c0_39 = arith.constant 0 : index
    %c0_40 = arith.constant 0 : index
    %c0_41 = arith.constant 0 : index
    %118 = vector.load %arg9[%c0_39, %c0_40, %c0_41] : memref<1x512x128xbf16, #tpu.memory_space<vmem>>, vector<1x512x128xbf16>
    %119 = vector.shape_cast %118 : vector<1x512x128xbf16> to vector<512x128xbf16>
    %cst_42 = arith.constant dense<0.000000e+00> : vector<16x128xf32>
    %120 = tpu.matmul %117, %119, %cst_42 {dimension_numbers = #tpu.dot_dimension_numbers<[1], [0], [0], [1], [0, 0, 1, 1], [], []>} : vector<16x512xbf16>, vector<512x128xbf16>, vector<16x128xf32> -> vector<16x128xf32>
    %121 = vector.broadcast %11 : vector<1x128xf32> to vector<16x128xf32>
    %122 = arith.addf %120, %121 : vector<16x128xf32>
    %123 = arith.addf %73, %122 : vector<16x128xf32>
    %c0_43 = arith.constant 0 : index
    %c0_44 = arith.constant 0 : index
    %124 = vector.load %arg13[%c0_43, %c0_44] : memref<16x128xf32, #tpu.memory_space<vmem>>, vector<16x128xf32>
    tpu.vector_store %arg13[%c0_43, %c0_44], %123 {strides = array<i32>} : memref<16x128xf32, #tpu.memory_space<vmem>>, vector<16x128xf32>,
    %c1_i32 = arith.constant 1 : i32
    %125 = arith.cmpi eq, %arg1, %c1_i32 : i32
    %126 = arith.extui %125 : i1 to i32
    %c0_i32_45 = arith.constant 0 : i32
    %127 = arith.cmpi ne, %126, %c0_i32_45 : i32
    scf.if %127 {
      %c0_46 = arith.constant 0 : index
      %c0_47 = arith.constant 0 : index
      %128 = vector.load %arg10[%c0_46, %c0_47] : memref<2x128xf32, #tpu.memory_space<vmem>>, vector<2x128xf32>
      %129 = vector.extract_strided_slice %128 {offsets = [0, 0], sizes = [1, 128], strides = [1, 1]} : vector<2x128xf32> to vector<1x128xf32>
      %130 = vector.extract_strided_slice %128 {offsets = [1, 0], sizes = [1, 128], strides = [1, 1]} : vector<2x128xf32> to vector<1x128xf32>
      %cst_48 = arith.constant dense<0.000000e+00> : vector<16xf32>
      %131 = vector.multi_reduction <add>, %123, %cst_48 [1] : vector<16x128xf32> to vector<16xf32>
      %132 = vector.shape_cast %131 : vector<16xf32> to vector<16x1xf32>
      %cst_49 = arith.constant 1.280000e+02 : f32
      %133 = vector.broadcast %cst_49 : f32 to vector<16x1xf32>
      %134 = arith.divf %132, %133 : vector<16x1xf32>
      %135 = arith.mulf %123, %123 : vector<16x128xf32>
      %cst_50 = arith.constant dense<0.000000e+00> : vector<16xf32>
      %136 = vector.multi_reduction <add>, %135, %cst_50 [1] : vector<16x128xf32> to vector<16xf32>
      %137 = vector.shape_cast %136 : vector<16xf32> to vector<16x1xf32>
      %cst_51 = arith.constant 1.280000e+02 : f32
      %138 = vector.broadcast %cst_51 : f32 to vector<16x1xf32>
      %139 = arith.divf %137, %138 : vector<16x1xf32>
      %140 = arith.mulf %134, %134 : vector<16x1xf32>
      %141 = arith.subf %139, %140 : vector<16x1xf32>
      %142 = vector.broadcast %134 : vector<16x1xf32> to vector<16x128xf32>
      %143 = arith.subf %123, %142 : vector<16x128xf32>
      %cst_52 = arith.constant 9.99999974E-6 : f32
      %144 = vector.broadcast %cst_52 : f32 to vector<16x1xf32>
      %145 = arith.addf %141, %144 : vector<16x1xf32>
      %146 = math.rsqrt %145 : vector<16x1xf32>
      %147 = vector.broadcast %146 : vector<16x1xf32> to vector<16x128xf32>
      %148 = arith.mulf %143, %147 : vector<16x128xf32>
      %149 = vector.broadcast %129 : vector<1x128xf32> to vector<16x128xf32>
      %150 = arith.mulf %148, %149 : vector<16x128xf32>
      %151 = vector.broadcast %130 : vector<1x128xf32> to vector<16x128xf32>
      %152 = arith.addf %150, %151 : vector<16x128xf32>
      %153 = arith.truncf %152 : vector<16x128xf32> to vector<16x128xbf16>
      %c0_53 = arith.constant 0 : index
      %c0_54 = arith.constant 0 : index
      %154 = vector.load %arg11[%c0_53, %c0_54] : memref<128x256xbf16, #tpu.memory_space<vmem>>, vector<128x256xbf16>
      %cst_55 = arith.constant dense<0.000000e+00> : vector<16x256xf32>
      %155 = tpu.matmul %153, %154, %cst_55 {dimension_numbers = #tpu.dot_dimension_numbers<[1], [0], [0], [1], [0, 0, 1, 1], [], []>} : vector<16x128xbf16>, vector<128x256xbf16>, vector<16x256xf32> -> vector<16x256xf32>
      %c0_56 = arith.constant 0 : index
      %c0_57 = arith.constant 0 : index
      %156 = vector.load %arg12[%c0_56, %c0_57] : memref<16x256xf32, #tpu.memory_space<vmem>>, vector<16x256xf32>
      tpu.vector_store %arg12[%c0_56, %c0_57], %155 {strides = array<i32>} : memref<16x256xf32, #tpu.memory_space<vmem>>, vector<16x256xf32>,
    } else {
    }
    return
  }
  func.func @transform_0(%arg0: i32, %arg1: i32) -> (i32, i32) {
    %c0_i32 = arith.constant 0 : i32
    %c0_i32_0 = arith.constant 0 : i32
    return %arg0, %c0_i32 : i32, i32
  }
  func.func @transform_1(%arg0: i32, %arg1: i32) -> (i32, i32) {
    %c0_i32 = arith.constant 0 : i32
    %c0_i32_0 = arith.constant 0 : i32
    %c0_i32_1 = arith.constant 0 : i32
    return %c0_i32, %c0_i32_0 : i32, i32
  }
  func.func @transform_2(%arg0: i32, %arg1: i32) -> (i32, i32, i32) {
    %c0_i32 = arith.constant 0 : i32
    %c0_i32_0 = arith.constant 0 : i32
    %c0_i32_1 = arith.constant 0 : i32
    return %arg1, %c0_i32, %c0_i32_0 : i32, i32, i32
  }
  func.func @transform_3(%arg0: i32, %arg1: i32) -> (i32, i32, i32) {
    %c0_i32 = arith.constant 0 : i32
    %c0_i32_0 = arith.constant 0 : i32
    %c0_i32_1 = arith.constant 0 : i32
    return %arg1, %c0_i32, %c0_i32_0 : i32, i32, i32
  }
  func.func @transform_4(%arg0: i32, %arg1: i32) -> (i32, i32, i32) {
    %c0_i32 = arith.constant 0 : i32
    %c0_i32_0 = arith.constant 0 : i32
    %c0_i32_1 = arith.constant 0 : i32
    return %arg1, %c0_i32, %c0_i32_0 : i32, i32, i32
  }
  func.func @transform_5(%arg0: i32, %arg1: i32) -> (i32, i32, i32) {
    %c0_i32 = arith.constant 0 : i32
    %c0_i32_0 = arith.constant 0 : i32
    %c0_i32_1 = arith.constant 0 : i32
    return %arg1, %c0_i32, %c0_i32_0 : i32, i32, i32
  }
  func.func @transform_6(%arg0: i32, %arg1: i32) -> (i32, i32, i32) {
    %c0_i32 = arith.constant 0 : i32
    %c0_i32_0 = arith.constant 0 : i32
    %c0_i32_1 = arith.constant 0 : i32
    return %arg1, %c0_i32, %c0_i32_0 : i32, i32, i32
  }
  func.func @transform_7(%arg0: i32, %arg1: i32) -> (i32, i32, i32) {
    %c0_i32 = arith.constant 0 : i32
    %c0_i32_0 = arith.constant 0 : i32
    %c0_i32_1 = arith.constant 0 : i32
    return %arg1, %c0_i32, %c0_i32_0 : i32, i32, i32
  }
  func.func @transform_8(%arg0: i32, %arg1: i32) -> (i32, i32) {
    %c0_i32 = arith.constant 0 : i32
    %c0_i32_0 = arith.constant 0 : i32
    %c0_i32_1 = arith.constant 0 : i32
    return %c0_i32, %c0_i32_0 : i32, i32
  }
  func.func @transform_9(%arg0: i32, %arg1: i32) -> (i32, i32) {
    %c0_i32 = arith.constant 0 : i32
    %c0_i32_0 = arith.constant 0 : i32
    %c0_i32_1 = arith.constant 0 : i32
    return %c0_i32, %c0_i32_0 : i32, i32
  }
  func.func @transform_10(%arg0: i32, %arg1: i32) -> (i32, i32) {
    %c0_i32 = arith.constant 0 : i32
    %c0_i32_0 = arith.constant 0 : i32
    return %arg0, %c0_i32 : i32, i32
  }
}

</mosaic_0001>

<bundles_post_ra>
// kernel: gpt_forward.1
= control target key start
LH: loop header
LB: loop body
LE: loop exit
PB: predicated region body
PF: predicated region fallthrough
CT: control target
= control target key end

     0   :  { %s5584_s0 = inlined_call_operand.vmem [shape: f32[32,128], index: 0, kind: input, shape index: {}]   ;;  %s5585_s1 = inlined_call_operand.vmem [shape: f32[16,16], index: 1, kind: input, shape index: {}]   ;;  %s5586_s2 = inlined_call_operand.vmem [shape: f32[2,6,128], index: 2, kind: input, shape index: {}]   ;;  %s5587_s3 = inlined_call_operand.hbm [shape: bf16[2,128,384], index: 3, kind: input, shape index: {}]   ;;  %s5588_s4 = inlined_call_operand.hbm [shape: bf16[2,128,128], index: 4, kind: input, shape index: {}]   ;;  %s5589_s5 = inlined_call_operand.vmem [shape: bf16[2,128,512], index: 5, kind: input, shape index: {}]   ;;  %s5590_s6 = inlined_call_operand.vmem [shape: f32[2,1,512], index: 6, kind: input, shape index: {}]   ;;  %s5591_s7 = inlined_call_operand.hbm [shape: bf16[2,512,128], index: 7, kind: input, shape index: {}]   ;;  %s5592_s8 = inlined_call_operand.vmem [shape: f32[2,128], index: 8, kind: input, shape index: {}]   ;;  %s5593_s9 = inlined_call_operand.hbm [shape: bf16[128,256], index: 9, kind: input, shape index: {}]   ;;  %s5594_s10 = inlined_call_operand.hbm [shape: f32[32,256], index: 10, kind: output, shape index: {}]  }
   0x1   :  { %5619 = sst [smem:[#allocation27_spill]] %s5585_s1 }
   0x2   :  { %5620 = sst [smem:[#allocation28_spill]] %s5586_s2 }
   0x3   :  { %5621 = sst [smem:[#allocation29_spill]] %s5587_s3 }
   0x4   :  { %5622 = sst [smem:[#allocation30_spill]] %s5588_s4 }
   0x5   :  { %5623 = sst [smem:[#allocation31_spill]] %s5589_s5 }
   0x6   :  { %5624 = sst [smem:[#allocation32_spill]] %s5590_s6 }
   0x7   :  { %5625 = sst [smem:[#allocation33_spill]] %s5591_s7 }
   0x8   :  { %5626 = sst [smem:[#allocation34_spill]] %s5592_s8 }
   0x9   :  { %5627 = sst [smem:[#allocation35_spill]] %s5594_s10 }
   0xa   :  { %15 = vsyncpa [#allocation4], 0 }
   0xb   :  { %17 = vsyncpa [#allocation4 + $0x1], 0 }
   0xc   :  { %18 = vsyncpa [#allocation7], 0 }
   0xd   :  { %20 = vsyncpa [#allocation7 + $0x1], 0 }
   0xe   :  { %21 = vsyncpa [#allocation10], 0 }
   0xf   :  { %22 = vsyncpa [#allocation5], 0 }
  0x10   :  { %24 = vsyncpa [#allocation5 + $0x1], 0  ;;  %s4723_s13 = smov 0   ;;  %s4725_s14 = smov 0  }
  0x11   :  { %s4727_s15 = smov 0   ;;  %s4729_s16 = smov 0  }
  0x12   :  { %s4731_s17 = smov 0   ;;  %s4733_s18 = smov 0  }
  0x13   :  { %s4735_s19 = smov 0   ;;  %s4737_s20 = smov 0  }
  0x14   :  { %s4739_s21 = smov 0   ;;  %s4741_s22 = smov 0  }
  0x15   :  { %s4743_s23 = smov 0  }
  0x16 LB: > { %5628 = sst [smem:[#allocation16_spill]] %s4604_s13  ;;  %s39_s24 = sadd.s32 1, %s4636_s21  ;;  %s4644_s23 = sphi %s4743_s23, %s30_s23   ;;  %s4640_s22 = sphi %s4741_s22, %s5677_s22   ;;  %s4636_s21 = sphi %s4739_s21, %s5683_s21   ;;  %s4632_s20 = sphi %s4737_s20, %s5675_s20   ;;  %s4628_s19 = sphi %s4735_s19, %s5682_s19   ;;  %s4624_s18 = sphi %s4733_s18, %s5674_s18   ;;  %s4620_s17 = sphi %s4731_s17, %s5681_s17   ;;  %s4616_s16 = sphi %s4729_s16, %s5680_s16   ;;  %s4612_s15 = sphi %s4727_s15, %s5672_s15   ;;  %s4608_s14 = sphi %s4725_s14, %s5679_s14   ;;  %s4604_s13 = sphi %s4723_s13, %s5678_s13  }
  0x17   : > { %5629 = sst [smem:[#allocation17_spill]] %s4612_s15  ;;  %s42_s25 = sadd.s32 1, %s4640_s22 }
  0x18   : > { %5630 = sst [smem:[#allocation18_spill]] %s4624_s18  ;;  %p40_p0 = scmp.ge.s32.totalorder %s39_s24, 2 }
  0x19   : > { %5631 = sst [smem:[#allocation19_spill]] %s4640_s22  ;;  %s122_s26 = sadd.s32 1, %s4624_s18 }
  0x1a   : > { %5632 = sst [smem:[#allocation20_spill]] %s4644_s23  ;;  %p129_p1 = scmp.ne.s32.totalorder %s4624_s18, %s4620_s17 }
  0x1b   : > { %p130_p2 = scmp.eq.s32.totalorder %s4644_s23, 0  ;;  %s5685_s24 = smov (%p40_p0, %s39_s24), 0 }
  0x1c   : > { %5633 = sst [smem:[#allocation21_spill]] %s5685_s24  ;;  %s5687_s25 = smov (!%p40_p0, %s42_s25), %s4640_s22 }
  0x1d   : > { %s119_s27 = ssub.s32 %s4636_s21, %s5685_s24  ;;  %p131_p3 = por %p130_p2, %p129_p1 }
  0x1e   : > { %p44_p4 = scmp.ge.s32.totalorder %s5687_s25, 2  ;;  %p120_p5 = scmp.eq.s32.totalorder %s119_s27, 0 }
  0x1f   : > { %p4065_p6 = scmp.lt.s32.totalorder %s4644_s23, 4  ;;  %s4796_s29 = sand.u32 1, %s4624_s18  }
  0x20   : > { %s5689_s25 = smov (%p44_p4, %s5687_s25), 0  ;;  %s387_s11 = sand.u32 1, %s4644_s23  }
  0x21   : > { %5634 = sst [smem:[#allocation22_spill]] %s5689_s25  ;;  %p4798_p7 = pnand %p4065_p6, %p131_p3 }
  0x22   : > { %s4793_s28 = scalar_select %p120_p5, %s4624_s18, %s122_s26  }
  0x23   : > { %s5636_s30 = scalar_select %p4798_p7, 1, 0 }
  0x24   : > { %5635 = sst [smem:[#allocation23_spill]] %s4793_s28  ;;  %s3699_s12 = sshll.u32 %s4796_s29, 6 }
  0x25   : > { %s3860_s10 = sshll.u32 %s4636_s21, 10  ;;  %s5637_s4 = sld [smem:[#allocation30_spill]] }
  0x26   : > { %s391_s26 = scalar_lea.vmem [#allocation6], %s3699_s12  ;;  %s4812_s18 = scalar_lea.sflag [#allocation7], %s387_s11 }
  0x27   : > { %s398_s28 = sshll.u32 %s391_s26, 4  ;;  %p4818_p9 = pneg %p4798_p7  ;;  %s4810_s28 = int_to_ptr.vmem [resolvable:$true] %s398_s28 }
  0x29   : > { %s5638_s6 = scalar_select %p4818_p9, 1, 0 }
  0x2b   : > { %s4808_s27 = scalar_lea.hbm %s5637_s4, %s3860_s10  ;;  %s4401_s24 = scalar_lea.hbm %s5637_s4, 2048 }
  0x2c   : > { %s4396_s1 = scalar_lea.hbm %s4808_s27, 1024  ;;  %p4402_p12 = scmp.lt.u32.totalorder %s4808_s27, %s5637_s4 }
  0x2d   : > { %p4397_p8 = scmp.ne.s32.totalorder %s4808_s27, %s4396_s1  ;;  %p4403_p13 = scmp.lt.u32.totalorder %s4401_s24, %s4396_s1 }
  0x2e   : > { %p4405_p1 = scmp.lt.u32.totalorder %s4396_s1, %s4808_s27 }
  0x2f   : > { %p4399_p10 = pnand %p4818_p9, %p4397_p8  ;;  %p4404_p0 = por %p4403_p13, %p4402_p12 }
  0x31   : > { %p4400_p11 = pneg %p4399_p10  ;;  %p4406_p2 = por %p4405_p1, %p4404_p0 }
  0x33   : > { %p4407_p3 = pnand %p4406_p2, %p4400_p11 }
  0x35   : > { %4410 = shalt.err (!%p4407_p3)
}
  0x36   : > { %s4411_s11 = scalar_lea.vmem %s4810_s28, 1024  ;;  %s4646_s8 = smov [#allocation6]  }
  0x37   : > { %p4412_p4 = scmp.ne.s32.totalorder %s4810_s28, %s4411_s11  ;;  %s4416_s10 = sshll.u32 %s4646_s8, 4  ;;  %s4417_s10 = int_to_ptr.vmem [resolvable:$false] %s4416_s10 }
  0x38   : > { %s4418_s12 = scalar_lea.vmem %s4417_s10, 2048  ;;  %p4419_p8 = scmp.lt.s32.totalorder %s4810_s28, %s4417_s10 }
  0x39   : > { %p4414_p5 = pnand %p4412_p4, %p4818_p9  ;;  %p4420_p10 = scmp.lt.s32.totalorder %s4418_s12, %s4411_s11 }
  0x3b   : > { %p4415_p6 = pneg %p4414_p5  ;;  %p4421_p12 = por %p4420_p10, %p4419_p8 }
  0x3d   : > { %p4422_p13 = pnand %p4421_p12, %p4415_p6 }
  0x3f   : > { %4425 = shalt.err (!%p4422_p13)
}
  0x40   : > { %s5599_s1 = smov 64   ;;  %s5600_s24 = smov 4  }
  0x41   : > { %4056 = dma.hbm_to_vmem [thread:$0]  (!%p4798_p7), %s4808_s27, 1024, %s4810_s28, %s4812_s18, %s5599_s1, %s5599_s1, %s5600_s24  }
  0x42   : > { %s4846_s26 = sadd.s32 4294967295, %s4644_s23   ;;  %s3694_s11 = sadd.s32 4294967294, %s4644_s23  }
  0x43   : > { %p135_p11 = scmp.ne.s32.totalorder %s4620_s17, %s4616_s16  ;;  %p5608_p0 = scmp.eq.s32.totalorder %s4846_s26, 0 }
  0x44   : > { %s291_s8 = ssub.s32 %s4640_s22, %s5689_s25  ;;  %s294_s10 = sadd.s32 1, %s4612_s15 }
  0x45   : > { %p292_p1 = scmp.eq.s32.totalorder %s291_s8, 0  ;;  %p4857_p2 = por %p5608_p0, %p135_p11 }
  0x46   : > { %p304_p3 = scmp.ne.s32.totalorder %s4612_s15, %s4608_s14  ;;  %p305_p4 = scmp.eq.s32.totalorder %s4846_s26, 3 }
  0x47   : > { %s5639_s12 = scalar_select %p4857_p2, 1, 0 }
  0x48   : > { %s4864_s28 = scalar_select %p292_p1, %s4612_s15, %s294_s10  }
  0x49   : > { %p310_p5 = scmp.ne.s32.totalorder %s4608_s14, %s4604_s13  ;;  %p311_p6 = scmp.eq.s32.totalorder %s3694_s11, 3 }
  0x4a   : > { %5640 = sst [smem:[#allocation24_spill]] %s4864_s28  ;;  %p3695_p8 = scmp.ge.s32.totalorder %s4644_s23, 1 }
  0x4b   : > { %p4870_p10 = por %p305_p4, %p304_p3  ;;  %p318_p12 = scmp.lt.s32.totalorder %s4644_s23, 5 }
  0x4c   : > { %p4875_p13 = por %p311_p6, %p310_p5  ;;  %s4649_s10 = smov [#allocation9]  }
  0x4d   : > { %s5641_s16 = scalar_select %p4870_p10, 1, 0 }
  0x4e   : > { %s5643_s27 = scalar_select %p4875_p13, 1, 0 }
  0x4f   : > { %5642 = sst [smem:[#allocation25_spill]] %s5641_s16  ;;  %p4879_p11 = pnand %p3695_p8, %p318_p12 }
  0x50   : > { %5644 = sst [smem:[#allocation26_spill]] %s5643_s27  ;;  %s336_s1 = sshll.u32 %s4649_s10, 4  ;;  %s337_s1 = int_to_ptr.vmem [resolvable:$true] %s336_s1 }
  0x51   : > { %s5645_s8 = scalar_select %p4879_p11, 1, 0 }
  0x52   : > { %p4046_p1 = pneg %p4879_p11  ;;  %s4031_s24 = smul.u32 192, %s4796_s29 }
  0x53   : > { %s4032_s4 = smul.u32 3072, %s4636_s21  ;;  %s4426_s28 = scalar_lea.hbm %s5593_s9, 2048 }
  0x54   : > { %p4887_p3 = pnand %p4046_p1, %p5608_p0  ;;  %p4427_p4 = scmp.ne.s32.totalorder %s5593_s9, %s4426_s28 }
  0x55   : > { %p4433_p12 = scmp.lt.u32.totalorder %s4426_s28, %s5593_s9 }
  0x56   : > { %p4428_p5 = pneg %p4887_p3 }
  0x58   : > { %p4429_p6 = pnand %p4428_p5, %p4427_p4 }
  0x5a   : > { %p4430_p8 = pneg %p4429_p6 }
  0x5c   : > { %p4435_p1 = pnand %p4433_p12, %p4430_p8 }
  0x5e   : > { %4438 = shalt.err (!%p4435_p1)
}
  0x5f   : > { %s4439_s23 = scalar_lea.vmem %s337_s1, 2048  ;;  %p4447_p2 = scmp.lt.s32.totalorder %s337_s1, %s337_s1 }
  0x60   : > { %p4440_p0 = scmp.ne.s32.totalorder %s337_s1, %s4439_s23  ;;  %p4448_p11 = scmp.lt.s32.totalorder %s4439_s23, %s4439_s23 }
  0x62   : > { %p4442_p13 = pnand %p4440_p0, %p4428_p5  ;;  %p4449_p7 = por %p4448_p11, %p4447_p2 }
  0x64   : > { %p4443_p10 = pneg %p4442_p13 }
  0x66   : > { %p4450_p9 = pnand %p4449_p7, %p4443_p10 }
  0x68   : > { %4453 = shalt.err (!%p4450_p9)
}
  0x69   : > { %s4650_s15 = smov 128   ;;  %s4651_s22 = smov 8  }
  0x6a   : > { %4049 = dma.hbm_to_vmem [thread:$0]  (!%p4887_p3), %s5593_s9, 2048, %s337_s1, [#allocation10], %s4650_s15, %s4650_s15, %s4651_s22  }
  0x6b   : > { %s5647_s3 = sld [smem:[#allocation29_spill]]  ;;  %s370_s23 = scalar_lea.vmem [#allocation3], %s4031_s24 }
  0x6c   : > { %s377_s16 = sshll.u32 %s370_s23, 4  ;;  %s367_s5 = scalar_lea.sflag [#allocation4], %s4796_s29  ;;  %s4914_s16 = int_to_ptr.vmem [resolvable:$true] %s377_s16 }
  0x6d   : > { %p5648_p9 = scmp.ne.s32.totalorder %s5638_s6, 0 }
  0x71   : > { %s4912_s10 = scalar_lea.hbm %s5647_s3, %s4032_s4  ;;  %s4459_s15 = scalar_lea.hbm %s5647_s3, 6144 }
  0x72   : > { %s4454_s2 = scalar_lea.hbm %s4912_s10, 3072  ;;  %p4460_p10 = scmp.lt.u32.totalorder %s4912_s10, %s5647_s3 }
  0x73   : > { %p4455_p7 = scmp.ne.s32.totalorder %s4912_s10, %s4454_s2  ;;  %p4461_p13 = scmp.lt.u32.totalorder %s4459_s15, %s4454_s2 }
  0x74   : > { %p4463_p3 = scmp.lt.u32.totalorder %s4454_s2, %s4912_s10 }
  0x75   : > { %p4457_p0 = pnand %p4455_p7, %p5648_p9  ;;  %p4462_p11 = por %p4461_p13, %p4460_p10 }
  0x77   : > { %p4458_p2 = pneg %p4457_p0  ;;  %p4464_p4 = por %p4463_p3, %p4462_p11 }
  0x79   : > { %p4465_p5 = pnand %p4464_p4, %p4458_p2 }
  0x7b   : > { %4468 = shalt.err (!%p4465_p5)
}
  0x7c   : > { %s4469_s24 = scalar_lea.vmem %s4914_s16, 3072  ;;  %s4652_s25 = smov [#allocation3]  }
  0x7d   : > { %p4470_p6 = scmp.ne.s32.totalorder %s4914_s16, %s4469_s24  ;;  %s4474_s13 = sshll.u32 %s4652_s25, 4  ;;  %s4475_s13 = int_to_ptr.vmem [resolvable:$false] %s4474_s13 }
  0x7e   : > { %s4476_s28 = scalar_lea.vmem %s4475_s13, 6144  ;;  %p4477_p1 = scmp.lt.s32.totalorder %s4914_s16, %s4475_s13 }
  0x7f   : > { %p4472_p8 = pnand %p4470_p6, %p5648_p9  ;;  %p4478_p7 = scmp.lt.s32.totalorder %s4476_s28, %s4469_s24 }
  0x81   : > { %p4473_p12 = pneg %p4472_p8  ;;  %p4479_p0 = por %p4478_p7, %p4477_p1 }
  0x83   : > { %p4480_p10 = pnand %p4479_p0, %p4473_p12 }
  0x85   : > { %4483 = shalt.err (!%p4480_p10)
}
  0x86   : > { %s4653_s2 = smov 192   ;;  %s4654_s27 = smov 12  }
  0x87   : > { %p5649_p2 = scmp.ne.s32.totalorder %s5636_s30, 0  ;;  %s3702_s23 = sshll.u32 %s4796_s29, 8 }
  0x88   : > { %s3861_s1 = sshll.u32 %s4636_s21, 12  ;;  %s5650_s7 = sld [smem:[#allocation33_spill]] }
  0x89   : > { %4053 = dma.hbm_to_vmem [thread:$0]  (!%p5649_p2), %s4912_s10, 3072, %s4914_s16, %s367_s5, %s4653_s2, %s4653_s2, %s4654_s27  }
  0x8a   : > { %s427_s22 = scalar_lea.vmem [#allocation8], %s3702_s23 }
  0x8b   : > { %s434_s24 = sshll.u32 %s427_s22, 4  ;;  %s4947_s24 = int_to_ptr.vmem [resolvable:$true] %s434_s24 }
  0x8e   : > { %s4945_s4 = scalar_lea.hbm %s5650_s7, %s3861_s1  ;;  %s4489_s16 = scalar_lea.hbm %s5650_s7, 8192 }
  0x8f   : > { %s4484_s25 = scalar_lea.hbm %s4945_s4, 4096  ;;  %p4490_p4 = scmp.lt.u32.totalorder %s4945_s4, %s5650_s7 }
  0x90   : > { %p4485_p13 = scmp.ne.s32.totalorder %s4945_s4, %s4484_s25  ;;  %p4491_p5 = scmp.lt.u32.totalorder %s4489_s16, %s4484_s25 }
  0x91   : > { %p4493_p8 = scmp.lt.u32.totalorder %s4484_s25, %s4945_s4 }
  0x92   : > { %p4487_p11 = pnand %p4485_p13, %p5648_p9  ;;  %p4492_p6 = por %p4491_p5, %p4490_p4 }
  0x94   : > { %p4488_p3 = pneg %p4487_p11  ;;  %p4494_p12 = por %p4493_p8, %p4492_p6 }
  0x96   : > { %p4495_p1 = pnand %p4494_p12, %p4488_p3 }
  0x98   : > { %4498 = shalt.err (!%p4495_p1)
}
  0x99   : > { %s4499_s28 = scalar_lea.vmem %s4947_s24, 4096  ;;  %s4655_s2 = smov [#allocation8]  }
  0x9a   : > { %p4500_p7 = scmp.ne.s32.totalorder %s4947_s24, %s4499_s28  ;;  %s4504_s27 = sshll.u32 %s4655_s2, 4  ;;  %s4505_s27 = int_to_ptr.vmem [resolvable:$false] %s4504_s27 }
  0x9b   : > { %s4506_s23 = scalar_lea.vmem %s4505_s27, 8192  ;;  %p4507_p13 = scmp.lt.s32.totalorder %s4947_s24, %s4505_s27 }
  0x9c   : > { %p4502_p0 = pnand %p4500_p7, %p5648_p9  ;;  %p4508_p11 = scmp.lt.s32.totalorder %s4506_s23, %s4499_s28 }
  0x9e   : > { %p4503_p10 = pneg %p4502_p0  ;;  %p4509_p4 = por %p4508_p11, %p4507_p13 }
  0xa0   : > { %p4510_p5 = pnand %p4509_p4, %p4503_p10 }
  0xa2   : > { %4513 = shalt.err (!%p4510_p5)
}
  0xa3   : > { %s5651_s1 = smov 4   ;;  %s5652_s11 = smov 64  }
  0xa4   : > { %4059 = dma.hbm_to_vmem [thread:$0]  (!%p5649_p2), %s4945_s4, 4096, %s4947_s24, %s4812_s18, %s5652_s11, %s5652_s11, %s5651_s1  }
  0xa5   : > { %p5653_p9 = scmp.ne.s32.totalorder %s5645_s8, 0 }
  0xa6   : > { %s448_s6 = sand.u32 (!%p5653_p9), 1, %s4620_s17   ;;  %p5654_p3 = scmp.ne.s32.totalorder (!%p5653_p9), %s5639_s12, 0 }
  0xa7   : > { %446 = sbr.rel (%p5653_p9) target bundleno = 2941 (0xb7d), region = 60  ;;  %s449_s22 = scalar_lea.sflag (!%p5653_p9), [#allocation4], %s448_s6 }
  0xa8   : > { %s4033_s15 = smul.u32 (!%p5653_p9), 192, %s448_s6 }
  0xaa   : > { %s4977_s25 = scalar_lea.vmem (!%p5653_p9), [#allocation3], %s4033_s15 }
  0xae   : > { %4587 = dma.done.wait (%p5654_p3), %s449_s22, 3072  }
  0xaf   : > { %4589 = vsyncadd (%p5654_p3), %s449_s22, 4294964224  ;;  %s457_s30 = sand.u32 1, %s4846_s26   ;;  %s3706_s5 = sshll.u32 %s448_s6, 6 }
  0xb0   : > { %s458_s18 = scalar_lea.sflag [#allocation7], %s457_s30  ;;  %s4984_s4 = scalar_lea.vmem [#allocation6], %s3706_s5 }
  0xb1   : > { %4591 = dma.done.wait (%p5654_p3), %s458_s18, 5120  }
  0xb2   : > { %4593 = vsyncadd (%p5654_p3), %s458_s18, 4294962176  ;;  %s3707_s8 = sshll.u32 %s448_s6, 8  ;;  %p5655_p2 = scmp.eq.s32.totalorder %s4846_s26, 0 }
  0xb3   : > { %s4990_s24 = scalar_lea.vmem [#allocation8], %s3707_s8 }
  0xb4   : > { %4595 = dma.done.wait (%p5655_p2), [#allocation10], 2048   ;;  %p5656_p6 = pmov %p5655_p2 }
  0xb5   : > { %s5618_s29 = sand.u32 1, %s4608_s14   ;;  %s3710_s16 = sshll.u32 %s4632_s20, 1 }
  0xb6   : > { %4597 = vsyncadd (%p5656_p6), [#allocation10], 4294965248  ;;  %s3709_s10 = sshll.u32 %s5618_s29, 5  ;;  %p540_p8 = scmp.lt.s32.totalorder %s3710_s16, 3 }
  0xb7   : > { %p545_p12 = scmp.lt.s32.totalorder %s4628_s19, 1  ;;  %s5657_s11 = sld [smem:[#allocation28_spill]] }
  0xb8   : > { %s5691_s16 = smov (!%p540_p8, %s3710_s16), 3  ;;  %s5658_s5 = sld [smem:[#allocation31_spill]] }
  0xb9   : > { %s546_s12 = scalar_select %p545_p12, %s4628_s19, 1 }
  0xba   : > { %s3711_s13 = sshll.u32 %s5691_s16, 3  ;;  %s5659_s16 = sld [smem:[#allocation32_spill]] }
  0xbb   : > { %s543_s27 = scalar_lea.vmem %s5584_s0, %s3711_s13  ;;  %s3712_s26 = sshll.u32 %s546_s12, 3 }
  0xbc   : > { %s3862_s15 = sshll.u32 %s546_s12, 8  ;;  %s3715_s8 = sshll.u32 %s546_s12, 2 }
  0xbd   : > { %s5008_s6 = scalar_lea.vmem %s5657_s11, %s3712_s26  ;;  %s5020_s28 = scalar_lea.vmem [#allocation11], %s3709_s10 }
  0xbe   : > { %s5013_s18 = scalar_lea.vmem %s5658_s5, %s3862_s15  ;;  %p3716_p1 = scmp.ne.s32.totalorder %s4628_s19, 0 }
  0xbf   : > { %v564_v0 = vld [vmem:[%s543_s27] sm:$0xff] (!%p3716_p1)  ;;  %v565_v1 = vld [vmem:[%s543_s27 + $0x8] sm:$0xff] (!%p3716_p1) }
  0xc0   : > { %s5018_s7 = scalar_lea.vmem %s5659_s16, %s3715_s8  ;;  %563 = sbr.rel (%p3716_p1) target bundleno = 199 (0xc7), region = 80  ;;  %566 = vst [vmem:[#allocation2] sm:$0xff] (!%p3716_p1), %v564_v0  ;;  %567 = vst [vmem:[#allocation2 + $0x8] sm:$0xff] (!%p3716_p1), %v565_v1 }
  0xc7 PF: > { %v5023_v2 = vld [vmem:[#allocation2] sm:$0xff]  ;;  %v5025_v3 = vld [vmem:[#allocation2 + $0x8] sm:$0xff]  ;;  %v4656_v6 = vmov 0.0   ;;  %v4191_v8 = vld [vmem:[%s4977_s25] ss:$12 sps:$4 sm:$0xff]   ;;  %v4657_v28 = vmov 0   ;;  %v598_v44 = vlaneseq }
  0xc8   : > { %571 = vadd.xlane.f32.xlu0 %v5023_v2  ;;  %v578_v4 = vmul.f32 %v5023_v2, %v5023_v2  ;;  %v4189_v5 = vld [vmem:[%s4977_s25 + $0x4] ss:$12 sps:$4 sm:$0xff]   ;;  %3943 = vmatprep.subr.bf16.mxu1 %v4656_v6  ;;  %v579_v7 = vmul.f32 %v5025_v3, %v5025_v3  ;;  %v4192_v9 = vld [vmem:[%s4977_s25 + $0x8] ss:$12 sps:$4 sm:$0xff]   ;;  %v4196_v12 = vld [vmem:[%s4977_s25 + $0x20] ss:$12 sps:$4 sm:$0xff]  }
  0xc9   : > { %771 = vmatprep.subr.bf16.mxu0 %v4189_v5  ;;  %3944 = vmatpush3.bf16.msra.mxu1 %v4192_v9  ;;  %v4193_v10 = vld [vmem:[%s4977_s25 + $0x1c] ss:$12 sps:$4 sm:$0xff]   ;;  %v4195_v11 = vld [vmem:[%s4977_s25 + $0x18] ss:$12 sps:$4 sm:$0xff]   ;;  %v4197_v13 = vld [vmem:[%s4977_s25 + $0x34] ss:$12 sps:$4 sm:$0xff]  }
  0xca   : > { %580 = vadd.xlane.f32.xlu1 %v578_v4  ;;  %772 = vmatpush1.bf16.msra.mxu0 %v4191_v8  ;;  %v4199_v14 = vld [vmem:[%s4977_s25 + $0x30] ss:$12 sps:$4 sm:$0xff]   ;;  %v4200_v15 = vld [vmem:[%s4977_s25 + $0x38] ss:$12 sps:$4 sm:$0xff]   ;;  %v4203_v17 = vld [vmem:[%s4977_s25 + $0x48] ss:$12 sps:$4 sm:$0xff]  }
  0xcb   : > { %3945 = vmatprep.subr.bf16.mxu1 %v4656_v6  ;;  %773 = vmatprep.subr.bf16.mxu0 %v4193_v10  ;;  %v4201_v16 = vld [vmem:[%s4977_s25 + $0x4c] ss:$12 sps:$4 sm:$0xff]   ;;  %v4204_v18 = vld [vmem:[%s4977_s25 + $0x50] ss:$12 sps:$4 sm:$0xff]   ;;  %v4208_v21 = vld [vmem:[%s4977_s25 + $0x68] ss:$12 sps:$4 sm:$0xff]  }
  0xcc   : > { %573 = vadd.xlane.f32.xlu0 %v5025_v3  ;;  %v4205_v19 = vld [vmem:[%s4977_s25 + $0x64] ss:$12 sps:$4 sm:$0xff]   ;;  %v4207_v20 = vld [vmem:[%s4977_s25 + $0x60] ss:$12 sps:$4 sm:$0xff]   ;;  %v4209_v22 = vld [vmem:[%s4977_s25 + $0x7c] ss:$12 sps:$4 sm:$0xff]   ;;  %803 = vmatprep.mubr.bf16.mxu0 %v4657_v28 }
  0xcd   : > { %3946 = vmatpush3.bf16.msra.mxu1 %v4196_v12  ;;  %v4211_v23 = vld [vmem:[%s4977_s25 + $0x78] ss:$12 sps:$4 sm:$0xff]   ;;  %v4212_v24 = vld [vmem:[%s4977_s25 + $0x80] ss:$12 sps:$4 sm:$0xff]   ;;  %v4215_v26 = vld [vmem:[%s4977_s25 + $0x90] ss:$12 sps:$4 sm:$0xff]  }
  0xce   : > { %582 = vadd.xlane.f32.xlu1 %v579_v7  ;;  %774 = vmatpush1.bf16.msra.mxu0 %v4195_v11  ;;  %v4213_v25 = vld [vmem:[%s4977_s25 + $0x94] ss:$12 sps:$4 sm:$0xff]   ;;  %v4216_v27 = vld [vmem:[%s4977_s25 + $0x98] ss:$12 sps:$4 sm:$0xff]   ;;  %vm4658_vm0 = vmmov 0   ;;  %v5070_v47 = vshrl.u32 %v598_v44, 7 }
  0xcf   : > { %3947 = vmatprep.subr.bf16.mxu1 %v4656_v6  ;;  %775 = vmatprep.subr.bf16.mxu0 %v4197_v13  ;;  %v4217_v29 = vld [vmem:[%s4977_s25 + $0xac] ss:$12 sps:$4 sm:$0xff]   ;;  %v4219_v30 = vld [vmem:[%s4977_s25 + $0xa8] ss:$12 sps:$4 sm:$0xff]   ;;  %v4220_v31 = vld [vmem:[%s4977_s25 + $0xb0] ss:$12 sps:$4 sm:$0xff]  }
  0xd0   : > { %3959 = vmatprep.mubr.msk.bf16.mxu1 %vm4658_vm0, %v4656_v6  ;;  %v5073_v48 = vsub.s32 0, %v5070_v47  ;;  %v570_v49 = vld [vmem:[%s5008_s6] sm:$0x3f]  ;;  %v5079_v54 = vsub.s32 1, %v5070_v47  ;;  %s4659_s3 = smov 64   ;;  %s4660_s25 = smov 96  }
  0xd1   : > { %3948 = vmatpush3.bf16.msra.mxu1 %v4200_v15  ;;  %s4661_s29 = smov 32   ;;  %v4662_v12 = vmov 1983009808   ;;  %v4663_v15 = vmov 1934713408   ;;  %vm1671_vm1 = vcmask 261120  }
  0xd2   : > { %776 = vmatpush1.bf16.msra.mxu0 %v4199_v14  ;;  %3949 = vmatprep.subr.bf16.mxu1 %v4656_v6  ;;  %v601_v53 = vrot.slane %v570_v49, %v5073_v48  ;;  %v607_v59 = vrot.slane %v570_v49, %v5079_v54  ;;  %v889_v13 = vunpack.c.l.s4 %v4662_v12  ;;  %s5660_s13 = sld [smem:[#allocation27_spill]]  ;;  %vm1860_vm2 = vcmask 130048   ;;  %p3837_p7 = scmp.ne.s32.totalorder %s4628_s19, 1 }
  0xd3   : > { %777 = vmatprep.subr.bf16.mxu0 %v4201_v16  ;;  %v920_v16 = vunpack.c.l.s4 %v4663_v15  ;;  %vm2427_vm3 = vcmask 523264   ;;  %vm2430_vm4 = vcmask 785408  }
  0xd4   : > { %v890_v14 = vunpack.c.0.s8 %v889_v13 }
  0xd5   : > { %3950 = vmatpush3.bf16.msra.mxu1 %v4204_v18 }
  0xd6   : > { %778 = vmatpush1.bf16.msra.mxu0 %v4203_v17  ;;  %3951 = vmatprep.subr.bf16.mxu1 %v4656_v6  ;;  %v5097_v17 = vpack.i.b16 %v4657_v28, %v4657_v28 }
  0xd7   : > { %779 = vmatprep.subr.bf16.mxu0 %v4205_v19 }
  0xd8   : > { %s5661_s2 = smov %s5660_s13 }
  0xd9   : > { %3952 = vmatpush3.bf16.msra.mxu1 %v4208_v21 }
  0xda   : > { %780 = vmatpush1.bf16.msra.mxu0 %v4207_v20  ;;  %3953 = vmatprep.subr.bf16.mxu1 %v4656_v6 }
  0xdb   : > { %781 = vmatprep.subr.bf16.mxu0 %v4209_v22 }
  0xdd   : > { %3954 = vmatpush3.bf16.msra.mxu1 %v4212_v24  ;;  %v921_v24 = vunpack.c.0.s8 %v920_v16 }
  0xde   : > { %782 = vmatpush1.bf16.msra.mxu0 %v4211_v23  ;;  %3955 = vmatprep.subr.bf16.mxu1 %v4656_v6  ;;  %v5100_v23 = vsub.s32 %v890_v14, %v5070_v47 }
  0xdf   : > { %783 = vmatprep.subr.bf16.mxu0 %v4213_v25 }
  0xe1   : > { %3956 = vmatpush3.bf16.msra.mxu1 %v4216_v27 }
  0xe2   : > { %784 = vmatpush1.bf16.msra.mxu0 %v4215_v26  ;;  %3957 = vmatprep.subr.bf16.mxu1 %v4656_v6 }
  0xe3   : > { %785 = vmatprep.subr.bf16.mxu0 %v4217_v29 }
  0xe5   : > { %3958 = vmatpush3.bf16.msra.mxu1 %v4220_v31 }
  0xe6   : > { %786 = vmatpush1.bf16.msra.mxu0 %v4219_v30  ;;  %3963 = vmatprep.subr.bf16.mxu1 %v4656_v6 }
  0xe7   : > { %3987 = vmatprep.subr.bf16.mxu0 %v4656_v6 }
 0x155   : > { %v572_v32 = vpop.xlane.xlu0 %571 }
 0x156   : > { %v576_v33 = vmul.f32 0.0078125, %v572_v32 }
 0x157   : > { %v581_v34 = vpop.xlane.xlu1 %580 }
 0x158   : > { %v586_v35 = vmul.f32 %v576_v33, %v576_v33  ;;  %v584_v36 = vmul.f32 0.0078125, %v581_v34  ;;  %v590_v50 = vsub.f32 %v5023_v2, %v576_v33  ;;  %v5105_v33 = vsub.s32 %v921_v24, %v5070_v47 }
 0x159   : > { %v574_v37 = vpop.xlane.xlu0 %573 }
 0x15a   : > { %v588_v38 = vsub.f32 %v584_v36, %v586_v35  ;;  %v577_v39 = vmul.f32 0.0078125, %v574_v37 }
 0x15b   : > { %v583_v40 = vpop.xlane.xlu1 %582 }
 0x15c   : > { %v592_v41 = vadd.f32 1e-05, %v588_v38  ;;  %v587_v42 = vmul.f32 %v577_v39, %v577_v39  ;;  %v585_v43 = vmul.f32 0.0078125, %v583_v40  ;;  %v591_v55 = vsub.f32 %v5025_v3, %v577_v39 }
 0x15e   : > { %4309 = vrsqrt.f32 %v592_v41  ;;  %v589_v45 = vsub.f32 %v585_v43, %v587_v42 }
 0x160   : > { %v593_v46 = vadd.f32 1e-05, %v589_v45 }
 0x162   : > { %4311 = vrsqrt.f32 %v593_v46 }
 0x168   : > { %v4310_v51 = vpop.eup %4309 }
 0x169   : > { %v596_v52 = vmul.f32 %v4310_v51, %v590_v50 }
 0x16b   : > { %v602_v58 = vmul.f32 %v601_v53, %v596_v52 }
 0x16c   : > { %v4312_v56 = vpop.eup %4311 }
 0x16d   : > { %v597_v57 = vmul.f32 %v4312_v56, %v591_v55  ;;  %v608_v61 = vadd.f32 %v607_v59, %v602_v58 }
 0x16f   : > { %v603_v60 = vmul.f32 %v601_v53, %v597_v57 }
 0x171   : > { %v609_v62 = vadd.f32 %v607_v59, %v603_v60 }
 0x173   : > { %v610_v63 = vpack.c.bf16 %v609_v62, %v608_v61 }
 0x175   : > { %804 = vmatmul.mubr.bf16.vlgmr.msra.gmra.mrb[0].mxu0 %v610_v63  ;;  %3960 = vmatmul.mubr.bf16.vlgmr.msra.gmra.mrb[0].mxu1 %v610_v63 }
 0x176   : > { %3965 = vmatprep.mubr.msk.bf16.mxu1 %vm4658_vm0, %v4656_v6  ;;  %3989 = vmatprep.mubr.msk.bf16.mxu0 %vm4658_vm0, %v4656_v6 }
 0x248   : > { %v805_v0 = vpop.f32.mrb[0].mxu0  ;;  %v848_v1 = vpop.f32.mrb[0].mxu1 }
 0x249   : > { %v807_v2 = vpop.f32.mrb[1].mxu0  ;;  %v3961_v3 = vpop.f32.mrb[1].mxu1 }
 0x24a   : > { %v809_v4 = vpop.f32.mrb[2].mxu0  ;;  %v851_v5 = vpop.f32.mrb[2].mxu1 }
 0x24b   : > { %v855_v7 = vpack.c.bf16 %v809_v4, %v805_v0  ;;  %v5087_v8 = vpack.c.bf16 %v851_v5, %v848_v1  ;;  %v811_v9 = vpop.f32.mrb[3].mxu0  ;;  %v3962_v10 = vpop.f32.mrb[3].mxu1 }
 0x24c   : > { %v856_v11 = vpack.c.bf16 %v811_v9, %v807_v2 }
 0x24d   : > { %v869_v40 = vshrl.u32 %v855_v7, 16 }
 0x24e   : > { %1134 = vrot.lane.b32.xlu1 %v856_v11, %s4659_s3  ;;  %1132 = vrot.lane.b32.xlu0 %v856_v11, %s4660_s25  ;;  %v1142_v21 = vshrl.u32 %v856_v11, 16 }
 0x252   : > { %1136 = vrot.lane.b32.xlu1 %v856_v11, %s4661_s29  ;;  %861 = vrot.lane.b32.xlu0 %v855_v7, %s4659_s3 }
 0x256   : > { %859 = vrot.lane.b32.xlu1 %v855_v7, %s4660_s25 }
 0x25a   : > { %863 = vrot.lane.b32.xlu1 %v855_v7, %s4661_s29 }
 0x2c0   : > { %v1135_v18 = vpop.permute.xlu1 %1134  ;;  %v1133_v19 = vpop.permute.xlu0 %1132 }
 0x2c1   : > { %v1140_v20 = vpack.i.b16 %v1133_v19, %v856_v11  ;;  %v1143_v22 = vshrl.u32 %v1133_v19, 16  ;;  %v1150_v31 = vshrl.u32 %v1135_v18, 16 }
 0x2c3   : > { %v1144_v25 = vpack.i.b16 %v1143_v22, %v1142_v21  ;;  %v1154_v26 = vcombine.high %v1140_v20, %v5097_v17  ;;  %v1161_v34 = vrot.slane %v1140_v20, %v5100_v23 }
 0x2c4   : > { %v1137_v27 = vpop.permute.xlu1 %1136  ;;  %v862_v1 = vpop.permute.xlu0 %861 }
 0x2c5   : > { %v1220_v29 = vcombine.high %v1144_v25, %v5097_v17  ;;  %v1148_v30 = vpack.i.b16 %v1137_v27, %v1135_v18  ;;  %v1151_v32 = vshrl.u32 %v1137_v27, 16  ;;  %v1168_v37 = vrot.slane %v1154_v26, %v5100_v23 }
 0x2c6   : > { %v1227_v38 = vrot.slane %v1144_v25, %v5100_v23  ;;  %v877_v12 = vshrl.u32 %v862_v1, 16 }
 0x2c7   : > { %v1169_v35 = vcombine.high %v1148_v30, %v5097_v17  ;;  %v1176_v36 = vrot.slane %v1148_v30, %v5100_v23  ;;  %v1152_v39 = vpack.i.b16 %v1151_v32, %v1150_v31  ;;  %v1234_v42 = vrot.slane %v1220_v29, %v5100_v23 }
 0x2c8   : > { %v860_v41 = vpop.permute.xlu1 %859 }
 0x2c9   : > { %v1183_v43 = vrot.slane %v1169_v35, %v5100_v23  ;;  %v1184_v44 = vcombine.low %v1161_v34, %v1176_v36  ;;  %v1185_v45 = vcombine.high %v1161_v34, %v1176_v36  ;;  %v1235_v46 = vcombine.high %v1152_v39, %v5097_v17 }
 0x2ca   : > { %v1242_v49 = vrot.slane %v1152_v39, %v5100_v23  ;;  %v867_v50 = vpack.i.b16 %v860_v41, %v855_v7  ;;  %v870_v51 = vshrl.u32 %v860_v41, 16 }
 0x2cb   : > { %v1192_v52 = vrot.slane %v1184_v44, %v5105_v33  ;;  %v1199_v53 = vrot.slane %v1185_v45, %v5105_v33  ;;  %v1200_v55 = vcombine.low %v1168_v37, %v1183_v43  ;;  %v1201_v56 = vcombine.high %v1168_v37, %v1183_v43 }
 0x2cc   : > { %v1249_v57 = vrot.slane %v1235_v46, %v5100_v23  ;;  %v1250_v58 = vcombine.low %v1227_v38, %v1242_v49  ;;  %v1251_v59 = vcombine.high %v1227_v38, %v1242_v49  ;;  %v871_v60 = vpack.i.b16 %v870_v51, %v869_v40  ;;  %v864_v10 = vpop.permute.xlu1 %863 }
 0x2cd   : > { %v1208_v61 = vrot.slane %v1200_v55, %v5105_v33  ;;  %v1215_v62 = vrot.slane %v1201_v56, %v5105_v33  ;;  %v1286_v63 = vcombine.low %v1192_v52, %v1199_v53  ;;  %v3745_v0 = vcombine.high %v1192_v52, %v1199_v53 }
 0x2ce   : > { %v1258_v2 = vrot.slane %v1250_v58, %v5105_v33  ;;  %v1265_v3 = vrot.slane %v1251_v59, %v5105_v33  ;;  %v1266_v4 = vcombine.low %v1234_v42, %v1249_v57  ;;  %v1267_v5 = vcombine.high %v1234_v42, %v1249_v57 }
 0x2cf   : > { %v1302_v7 = vcombine.low %v1208_v61, %v1215_v62  ;;  %v3746_v9 = vcombine.high %v1208_v61, %v1215_v62  ;;  %v5124_v11 = vrot.slane %v1286_v63, %v5100_v23  ;;  %v887_v15 = vcombine.high %v867_v50, %v5097_v17 }
 0x2d0   : > { %v1274_v13 = vrot.slane %v1266_v4, %v5105_v33  ;;  %v1281_v14 = vrot.slane %v1267_v5, %v5105_v33  ;;  %v953_v16 = vcombine.high %v871_v60, %v5097_v17  ;;  %v1301_v18 = vrot.slane %v3745_v0, %v5100_v23 }
 0x2d1   : > { %v1336_v19 = vcombine.low %v1258_v2, %v1265_v3  ;;  %v875_v20 = vpack.i.b16 %v864_v10, %v862_v1  ;;  %v878_v21 = vshrl.u32 %v864_v10, 16  ;;  %v3747_v22 = vcombine.high %v1258_v2, %v1265_v3 }
 0x2d2   : > { %v894_v24 = vrot.slane %v867_v50, %v5100_v23  ;;  %v1309_v25 = vrot.slane %v1302_v7, %v5100_v23  ;;  %v1317_v26 = vrot.slane %v3746_v9, %v5100_v23  ;;  %v960_v27 = vrot.slane %v871_v60, %v5100_v23 }
 0x2d3   : > { %v879_v29 = vpack.i.b16 %v878_v21, %v877_v12  ;;  %v902_v30 = vcombine.high %v875_v20, %v5097_v17  ;;  %v909_v31 = vrot.slane %v875_v20, %v5100_v23  ;;  %v1352_v32 = vcombine.low %v1274_v13, %v1281_v14 }
 0x2d4   : > { %v3748_v34 = vcombine.high %v1274_v13, %v1281_v14  ;;  %v901_v35 = vrot.slane %v887_v15, %v5100_v23  ;;  %v967_v36 = vrot.slane %v953_v16, %v5100_v23  ;;  %v1318_v42 = vcombine.low %v5124_v11, %v1301_v18 }
 0x2d5   : > { %v916_v37 = vrot.slane %v902_v30, %v5100_v23  ;;  %v917_v38 = vcombine.low %v894_v24, %v909_v31  ;;  %v918_v39 = vcombine.high %v894_v24, %v909_v31  ;;  %v968_v40 = vcombine.high %v879_v29, %v5097_v17 }
 0x2d6   : > { %v975_v41 = vrot.slane %v879_v29, %v5100_v23  ;;  %v1326_v43 = vcombine.low %v1309_v25, %v1317_v26  ;;  %v1343_v44 = vrot.slane %v1336_v19, %v5100_v23  ;;  %v1351_v55 = vrot.slane %v3747_v22, %v5100_v23 }
 0x2d7   : > { %v925_v45 = vrot.slane %v917_v38, %v5105_v33  ;;  %v932_v46 = vrot.slane %v918_v39, %v5105_v33  ;;  %v933_v49 = vcombine.low %v901_v35, %v916_v37  ;;  %v934_v50 = vcombine.high %v901_v35, %v916_v37 }
 0x2d8   : > { %v982_v51 = vrot.slane %v968_v40, %v5100_v23  ;;  %v983_v52 = vcombine.low %v960_v27, %v975_v41  ;;  %v984_v53 = vcombine.high %v960_v27, %v975_v41  ;;  %v1359_v58 = vrot.slane %v1352_v32, %v5100_v23 }
 0x2d9   : > { %v941_v56 = vrot.slane %v933_v49, %v5105_v33  ;;  %v948_v57 = vrot.slane %v934_v50, %v5105_v33  ;;  %v1367_v59 = vrot.slane %v3748_v34, %v5100_v23  ;;  %v1019_v0 = vcombine.low %v925_v45, %v932_v46 }
 0x2da   : > { %v991_v60 = vrot.slane %v983_v52, %v5105_v33  ;;  %v998_v61 = vrot.slane %v984_v53, %v5105_v33  ;;  %v999_v62 = vcombine.low %v967_v36, %v982_v51  ;;  %v1000_v63 = vcombine.high %v967_v36, %v982_v51 }
 0x2db   : > { %v3741_v1 = vcombine.high %v925_v45, %v932_v46  ;;  %v1035_v2 = vcombine.low %v941_v56, %v948_v57  ;;  %v3742_v3 = vcombine.high %v941_v56, %v948_v57  ;;  %v1368_v12 = vcombine.low %v1343_v44, %v1351_v55 }
 0x2dc   : > { %v1007_v4 = vrot.slane %v999_v62, %v5105_v33  ;;  %v1014_v5 = vrot.slane %v1000_v63, %v5105_v33  ;;  %v1069_v7 = vcombine.low %v991_v60, %v998_v61  ;;  %v3743_v9 = vcombine.high %v991_v60, %v998_v61 }
 0x2dd   : > { %v1042_v10 = vrot.slane %v1035_v2, %v5100_v23  ;;  %v1050_v11 = vrot.slane %v3742_v3, %v5100_v23  ;;  %v1026_v18 = vrot.slane %v1019_v0, %v5100_v23  ;;  %v1034_v19 = vrot.slane %v3741_v1, %v5100_v23 }
 0x2de   : > { %v1076_v13 = vrot.slane %v1069_v7, %v5100_v23  ;;  %v1084_v14 = vrot.slane %v3743_v9, %v5100_v23  ;;  %v1085_v15 = vcombine.low %v1007_v4, %v1014_v5  ;;  %v3744_v16 = vcombine.high %v1007_v4, %v1014_v5  ;;  %v1669_v5 = vld [vmem:[%s5660_s13] sm:$0xff]  ;;  %v1670_v9 = vld [vmem:[%s5661_s2 + $0x8] sm:$0xff] }
 0x2df   : > { %v1333_v20 = vrot.slane %v1326_v43, %v5105_v33  ;;  %v1376_v21 = vcombine.low %v1359_v58, %v1367_v59  ;;  %v1325_v25 = vrot.slane %v1318_v42, %v5105_v33  ;;  %v1059_v26 = vcombine.low %v1042_v10, %v1050_v11 }
 0x2e0   : > { %v1092_v22 = vrot.slane %v1085_v15, %v5100_v23  ;;  %v1100_v24 = vrot.slane %v3744_v16, %v5100_v23  ;;  %v1101_v27 = vcombine.low %v1076_v13, %v1084_v14  ;;  %v1375_v29 = vrot.slane %v1368_v12, %v5105_v33 }
 0x2e1   : > { %v1383_v30 = vrot.slane %v1376_v21, %v5105_v33  ;;  %v1051_v32 = vcombine.low %v1026_v18, %v1034_v19  ;;  %v1334_v34 = vcombine.low %v1325_v25, %v1333_v20  ;;  %v1066_v38 = vrot.slane %v1059_v26, %v5105_v33 }
 0x2e2   : > { %v1109_v31 = vcombine.low %v1092_v22, %v1100_v24  ;;  %v1108_v39 = vrot.slane %v1101_v27, %v5105_v33  ;;  %v1335_v53 = vcombine.high %v1325_v25, %v1333_v20 }
 0x2e3   : > { %v1384_v35 = vcombine.low %v1375_v29, %v1383_v30  ;;  %v1058_v40 = vrot.slane %v1051_v32, %v5105_v33  ;;  %v1389_v45 = vshrl.u32 %v1334_v34, 16  ;;  %v1385_v51 = vcombine.high %v1375_v29, %v1383_v30 }
 0x2e4   : > { %v1116_v36 = vrot.slane %v1109_v31, %v5105_v33  ;;  %v1395_v61 = vshrl.u32 %v1335_v53, 16 }
 0x2e5   : > { %v1388_v37 = vpack.i.b16 %v1384_v35, %v1334_v34  ;;  %v1390_v43 = vshrl.u32 %v1384_v35, 16  ;;  %v1067_v44 = vcombine.low %v1058_v40, %v1066_v38  ;;  %v1394_v56 = vpack.i.b16 %v1385_v51, %v1335_v53 }
 0x2e6   : > { %v1117_v42 = vcombine.low %v1108_v39, %v1116_v36  ;;  %v1396_v59 = vshrl.u32 %v1385_v51, 16  ;;  %v1118_v60 = vcombine.high %v1108_v39, %v1116_v36  ;;  %v1068_v62 = vcombine.high %v1058_v40, %v1066_v38 }
 0x2e7   : > { %v1676_v41 = vsel %vm1671_vm1, %v1388_v37, 0  ;;  %v1391_v49 = vpack.i.b16 %v1390_v43, %v1389_v45  ;;  %v1122_v55 = vshrl.u32 %v1067_v44, 16  ;;  %v1770_v58 = vsel %vm1671_vm1, %v1394_v56, 0 }
 0x2e8   : > { %3964 = vmatpush3.bf16.xpose.msra.mxu1 %v1676_v41  ;;  %v1121_v46 = vpack.i.b16 %v1117_v42, %v1067_v44  ;;  %v1123_v52 = vshrl.u32 %v1117_v42, 16  ;;  %v1397_v63 = vpack.i.b16 %v1396_v59, %v1395_v61  ;;  %v1127_v0 = vpack.i.b16 %v1118_v60, %v1068_v62 }
 0x2e9   : > { %3969 = vmatprep.subr.bf16.mxu1 %v4656_v6  ;;  %v1723_v50 = vsel %vm1671_vm1, %v1391_v49, 0  ;;  %v1129_v2 = vshrl.u32 %v1118_v60, 16  ;;  %v1128_v3 = vshrl.u32 %v1068_v62, 16 }
 0x2ea   : > { %v1124_v57 = vpack.i.b16 %v1123_v52, %v1122_v55  ;;  %v1817_v1 = vsel %vm1671_vm1, %v1397_v63, 0 }
 0x2eb   : > { %v1130_v4 = vpack.i.b16 %v1129_v2, %v1128_v3 }
 0x2ef   : > { %3966 = vmatmul.mubr.msk.bf16.vlgmr.msra.gmra.mrb[4].mxu1 %vm1671_vm1, %v1121_v46 }
 0x2f0   : > { %3970 = vmatpush3.bf16.xpose.msra.mxu1 %v1723_v50  ;;  %3971 = vmatprep.mubr.msk.bf16.mxu1 %vm4658_vm0, %v4656_v6 }
 0x2f1   : > { %3975 = vmatprep.subr.bf16.mxu1 %v4656_v6 }
 0x2f7   : > { %3972 = vmatmul.mubr.msk.bf16.vlgmr.msra.gmra.mrb[8].mxu1 %vm1671_vm1, %v1124_v57 }
 0x2f8   : > { %3976 = vmatpush3.bf16.xpose.msra.mxu1 %v1770_v58  ;;  %3977 = vmatprep.mubr.msk.bf16.mxu1 %vm4658_vm0, %v4656_v6 }
 0x2f9   : > { %3981 = vmatprep.subr.bf16.mxu1 %v4656_v6 }
 0x2ff   : > { %3978 = vmatmul.mubr.msk.bf16.vlgmr.msra.gmra.mrb[12].mxu1 %vm1671_vm1, %v1127_v0 }
 0x300   : > { %3982 = vmatpush3.bf16.xpose.msra.mxu1 %v1817_v1  ;;  %3983 = vmatprep.mubr.msk.bf16.mxu1 %vm4658_vm0, %v4656_v6 }
 0x301   : > { %3993 = vmatprep.subr.bf16.mxu1 %v4656_v6 }
 0x307   : > { %3984 = vmatmul.mubr.msk.bf16.vlgmr.msra.gmra.mrb[16].mxu1 %vm1671_vm1, %v1130_v4 }
 0x308   : > { %3995 = vmatprep.mubr.msk.bf16.mxu1 %vm4658_vm0, %v4656_v6 }
 0x3c2   : > { %v1712_v7 = vpop.f32.mrb[4].mxu1 }
 0x3c3   : > { %v1713_v10 = vadd.f32 %v1712_v7, %v1669_v5  ;;  %v3967_v11 = vpop.f32.mrb[5].mxu1 }
 0x3c4   : > { %v1715_v12 = vpop.f32.mrb[6].mxu1 }
 0x3c5   : > { %v1716_v13 = vadd.f32 %v1715_v12, %v1670_v9  ;;  %v3968_v14 = vpop.f32.mrb[7].mxu1  ;;  %v1861_v15 = vsel %vm1860_vm2, %v1713_v10, -inf }
 0x3c6   : > { %1862 = vmax.xlane.f32.xlu0 %v1861_v15 }
 0x3c7   : > { %v1864_v16 = vsel %vm1860_vm2, %v1716_v13, -inf }
 0x3c8   : > { %1865 = vmax.xlane.f32.xlu1 %v1864_v16 }
 0x3ca   : > { %v1759_v18 = vpop.f32.mrb[8].mxu1 }
 0x3cb   : > { %v1760_v19 = vadd.f32 %v1759_v18, %v1669_v5  ;;  %v3973_v20 = vpop.f32.mrb[9].mxu1 }
 0x3cc   : > { %v1762_v21 = vpop.f32.mrb[10].mxu1 }
 0x3cd   : > { %v1763_v22 = vadd.f32 %v1762_v21, %v1670_v9  ;;  %v3974_v24 = vpop.f32.mrb[11].mxu1  ;;  %v1867_v25 = vsel %vm1860_vm2, %v1760_v19, -inf  ;;  %v1409_v21 = vshrl.u32 %v5087_v8, 16 }
 0x3ce   : > { %1868 = vmax.xlane.f32.xlu0 %v1867_v25 }
 0x3cf   : > { %v1870_v26 = vsel %vm1860_vm2, %v1763_v22, -inf }
 0x3d2   : > { %1871 = vmax.xlane.f32.xlu0 %v1870_v26  ;;  %v1806_v27 = vpop.f32.mrb[12].mxu1 }
 0x3d3   : > { %v1807_v29 = vadd.f32 %v1806_v27, %v1669_v5  ;;  %v3979_v30 = vpop.f32.mrb[13].mxu1 }
 0x3d4   : > { %v1809_v31 = vpop.f32.mrb[14].mxu1 }
 0x3d5   : > { %v1810_v32 = vadd.f32 %v1809_v31, %v1670_v9  ;;  %v3980_v34 = vpop.f32.mrb[15].mxu1  ;;  %v1873_v35 = vsel %vm1860_vm2, %v1807_v29, -inf }
 0x3d6   : > { %1874 = vmax.xlane.f32.xlu0 %v1873_v35 }
 0x3d7   : > { %v1876_v36 = vsel %vm1860_vm2, %v1810_v32, -inf }
 0x3d8   : > { %1877 = vmax.xlane.f32.xlu1 %v1876_v36 }
 0x3da   : > { %v1853_v37 = vpop.f32.mrb[16].mxu1 }
 0x3db   : > { %v1854_v38 = vadd.f32 %v1853_v37, %v1669_v5  ;;  %v3985_v39 = vpop.f32.mrb[17].mxu1 }
 0x3dc   : > { %v1856_v40 = vpop.f32.mrb[18].mxu1 }
 0x3dd   : > { %v1857_v41 = vadd.f32 %v1856_v40, %v1670_v9  ;;  %v3986_v42 = vpop.f32.mrb[19].mxu1  ;;  %v1879_v43 = vsel %vm1860_vm2, %v1854_v38, -inf }
 0x3de   : > { %1880 = vmax.xlane.f32.xlu0 %v1879_v43 }
 0x3df   : > { %v1882_v44 = vsel %vm1860_vm2, %v1857_v41, -inf }
 0x3e0   : > { %1883 = vmax.xlane.f32.xlu1 %v1882_v44 }
 0x3f1   : > { %1401 = vrot.lane.b32.xlu1 %v5087_v8, %s4659_s3 }
 0x3f4   : > { %1399 = vrot.lane.b32.xlu0 %v5087_v8, %s4660_s25 }
 0x3f5   : > { %1403 = vrot.lane.b32.xlu1 %v5087_v8, %s4661_s29 }
 0x453   : > { %v1863_v45 = vpop.xlane.xlu0 %1862 }
 0x454   : > { %v1885_v46 = vsub.f32 %v1713_v10, %v1863_v45 }
 0x455   : > { %v1866_v49 = vpop.xlane.xlu1 %1865 }
 0x456   : > { %v1893_v50 = vmul.f32 1.442695, %v1885_v46  ;;  %v1886_v51 = vsub.f32 %v1716_v13, %v1866_v49 }
 0x458   : > { %4313 = vpow2.f32 %v1893_v50  ;;  %v1895_v52 = vmul.f32 1.442695, %v1886_v51 }
 0x45a   : > { %4315 = vpow2.f32 %v1895_v52 }
 0x45b   : > { %v1869_v53 = vpop.xlane.xlu0 %1868 }
 0x45c   : > { %v1887_v55 = vsub.f32 %v1760_v19, %v1869_v53 }
 0x45e   : > { %v1897_v56 = vmul.f32 1.442695, %v1887_v55 }
 0x45f   : > { %v1872_v57 = vpop.xlane.xlu0 %1871 }
 0x460   : > { %4317 = vpow2.f32 %v1897_v56  ;;  %v1888_v58 = vsub.f32 %v1763_v22, %v1872_v57 }
 0x462   : > { %v5212_v59 = vpop.eup %4313  ;;  %v1899_v60 = vmul.f32 1.442695, %v1888_v58 }
 0x463   : > { %v1875_v61 = vpop.xlane.xlu0 %1874  ;;  %v1909_v62 = vsel %vm1860_vm2, %v5212_v59, 0.0 }
 0x464   : > { %v5216_v63 = vpop.eup %4315  ;;  %4319 = vpow2.f32 %v1899_v60  ;;  %v1889_v0 = vsub.f32 %v1807_v29, %v1875_v61  ;;  %1910 = vadd.xlane.f32.xlu1 %v1909_v62 }
 0x465   : > { %v1878_v1 = vpop.xlane.xlu1 %1877  ;;  %v1912_v2 = vsel %vm1860_vm2, %v5216_v63, 0.0 }
 0x466   : > { %v1901_v3 = vmul.f32 1.442695, %v1889_v0  ;;  %v1890_v4 = vsub.f32 %v1810_v32, %v1878_v1  ;;  %1913 = vadd.xlane.f32.xlu0 %v1912_v2 }
 0x468   : > { %4321 = vpow2.f32 %v1901_v3  ;;  %v1903_v5 = vmul.f32 1.442695, %v1890_v4 }
 0x46a   : > { %v5220_v7 = vpop.eup %4317  ;;  %4323 = vpow2.f32 %v1903_v5 }
 0x46b   : > { %v1881_v9 = vpop.xlane.xlu0 %1880  ;;  %v1915_v10 = vsel %vm1860_vm2, %v5220_v7, 0.0 }
 0x46c   : > { %v1891_v11 = vsub.f32 %v1854_v38, %v1881_v9  ;;  %1916 = vadd.xlane.f32.xlu0 %v1915_v10 }
 0x46d   : > { %v1884_v12 = vpop.xlane.xlu1 %1883 }
 0x46e   : > { %v5224_v13 = vpop.eup %4319  ;;  %v1905_v14 = vmul.f32 1.442695, %v1891_v11  ;;  %v1892_v15 = vsub.f32 %v1857_v41, %v1884_v12 }
 0x46f   : > { %v1400_v16 = vpop.permute.xlu0 %1399  ;;  %v1918_v18 = vsel %vm1860_vm2, %v5224_v13, 0.0 }
 0x470   : > { %4325 = vpow2.f32 %v1905_v14  ;;  %v1907_v19 = vmul.f32 1.442695, %v1892_v15  ;;  %v1410_v20 = vshrl.u32 %v1400_v16, 16  ;;  %1919 = vadd.xlane.f32.xlu0 %v1918_v18  ;;  %v1407_v22 = vpack.i.b16 %v1400_v16, %v5087_v8 }
 0x471   : > { %v1402_v24 = vpop.permute.xlu1 %1401 }
 0x472   : > { %v5230_v25 = vpop.eup %4321  ;;  %4327 = vpow2.f32 %v1907_v19  ;;  %v1411_v26 = vpack.i.b16 %v1410_v20, %v1409_v21  ;;  %v1421_v30 = vcombine.high %v1407_v22, %v5097_v17  ;;  %v1417_v34 = vshrl.u32 %v1402_v24, 16 }
 0x473   : > { %v1921_v27 = vsel %vm1860_vm2, %v5230_v25, 0.0  ;;  %v1428_v37 = vrot.slane %v1407_v22, %v5100_v23 }
 0x474   : > { %v5234_v29 = vpop.eup %4323  ;;  %1922 = vadd.xlane.f32.xlu1 %v1921_v27  ;;  %v1487_v36 = vcombine.high %v1411_v26, %v5097_v17  ;;  %v1435_v41 = vrot.slane %v1421_v30, %v5100_v23  ;;  %v1494_v49 = vrot.slane %v1411_v26, %v5100_v23 }
 0x475   : > { %v1404_v31 = vpop.permute.xlu1 %1403  ;;  %v1924_v32 = vsel %vm1860_vm2, %v5234_v29, 0.0 }
 0x476   : > { %v1415_v35 = vpack.i.b16 %v1404_v31, %v1402_v24  ;;  %v1418_v8 = vshrl.u32 %v1404_v31, 16  ;;  %1925 = vadd.xlane.f32.xlu0 %v1924_v32  ;;  %v1501_v50 = vrot.slane %v1487_v36, %v5100_v23 }
 0x478   : > { %v1419_v38 = vpack.i.b16 %v1418_v8, %v1417_v34  ;;  %v1436_v39 = vcombine.high %v1415_v35, %v5097_v17  ;;  %v1443_v40 = vrot.slane %v1415_v35, %v5100_v23 }
 0x47a   : > { %v5244_v42 = vpop.eup %4325  ;;  %v1450_v43 = vrot.slane %v1436_v39, %v5100_v23  ;;  %v1451_v44 = vcombine.low %v1428_v37, %v1443_v40  ;;  %v1452_v45 = vcombine.high %v1428_v37, %v1443_v40  ;;  %v1502_v46 = vcombine.high %v1419_v38, %v5097_v17 }
 0x47b   : > { %v1509_v51 = vrot.slane %v1419_v38, %v5100_v23  ;;  %v1927_v52 = vsel %vm1860_vm2, %v5244_v42, 0.0 }
 0x47c   : > { %v5253_v53 = vpop.eup %4327  ;;  %v1459_v55 = vrot.slane %v1451_v44, %v5105_v33  ;;  %v1466_v56 = vrot.slane %v1452_v45, %v5105_v33  ;;  %v1467_v57 = vcombine.low %v1435_v41, %v1450_v43  ;;  %v1468_v58 = vcombine.high %v1435_v41, %v1450_v43  ;;  %1928 = vadd.xlane.f32.xlu1 %v1927_v52 }
 0x47d   : > { %v1516_v17 = vrot.slane %v1502_v46, %v5100_v23  ;;  %v1517_v60 = vcombine.low %v1494_v49, %v1509_v51  ;;  %v1518_v61 = vcombine.high %v1494_v49, %v1509_v51  ;;  %v1930_v62 = vsel %vm1860_vm2, %v5253_v53, 0.0 }
 0x47e   : > { %v1475_v0 = vrot.slane %v1467_v57, %v5105_v33  ;;  %v1482_v1 = vrot.slane %v1468_v58, %v5105_v33  ;;  %v1553_v2 = vcombine.low %v1459_v55, %v1466_v56  ;;  %v3749_v3 = vcombine.high %v1459_v55, %v1466_v56  ;;  %1931 = vadd.xlane.f32.xlu0 %v1930_v62 }
 0x47f   : > { %v1525_v4 = vrot.slane %v1517_v60, %v5105_v33  ;;  %v1532_v5 = vrot.slane %v1518_v61, %v5105_v33  ;;  %v1533_v9 = vcombine.low %v1501_v50, %v1516_v17  ;;  %v1534_v10 = vcombine.high %v1501_v50, %v1516_v17 }
 0x480   : > { %v1560_v11 = vrot.slane %v1553_v2, %v5100_v23  ;;  %v1568_v12 = vrot.slane %v3749_v3, %v5100_v23  ;;  %v1569_v14 = vcombine.low %v1475_v0, %v1482_v1  ;;  %v3750_v15 = vcombine.high %v1475_v0, %v1482_v1 }
 0x481   : > { %v1541_v16 = vrot.slane %v1533_v9, %v5105_v33  ;;  %v1548_v18 = vrot.slane %v1534_v10, %v5105_v33  ;;  %v1603_v19 = vcombine.low %v1525_v4, %v1532_v5  ;;  %v3751_v20 = vcombine.high %v1525_v4, %v1532_v5 }
 0x482   : > { %v1576_v21 = vrot.slane %v1569_v14, %v5100_v23  ;;  %v1584_v22 = vrot.slane %v3750_v15, %v5100_v23  ;;  %v1585_v24 = vcombine.low %v1560_v11, %v1568_v12 }
 0x483   : > { %v1610_v26 = vrot.slane %v1603_v19, %v5100_v23  ;;  %v1618_v27 = vrot.slane %v3751_v20, %v5100_v23  ;;  %v1619_v30 = vcombine.low %v1541_v16, %v1548_v18  ;;  %v3752_v31 = vcombine.high %v1541_v16, %v1548_v18 }
 0x484   : > { %v1593_v32 = vcombine.low %v1576_v21, %v1584_v22  ;;  %v1592_v36 = vrot.slane %v1585_v24, %v5105_v33 }
 0x485   : > { %v1626_v34 = vrot.slane %v1619_v30, %v5100_v23  ;;  %v1634_v35 = vrot.slane %v3752_v31, %v5100_v23  ;;  %v1635_v8 = vcombine.low %v1610_v26, %v1618_v27  ;;  %v4223_v26 = vld [vmem:[%s4984_s4 + $0x10] sm:$0xff]   ;;  %v4226_v27 = vld [vmem:[%s4984_s4 + $0x28] sm:$0xff]  }
 0x486   : > { %v1600_v37 = vrot.slane %v1593_v32, %v5105_v33 }
 0x487   : > { %v1643_v38 = vcombine.low %v1626_v34, %v1634_v35  ;;  %v1642_v41 = vrot.slane %v1635_v8, %v5105_v33 }
 0x488   : > { %v1601_v39 = vcombine.low %v1592_v36, %v1600_v37  ;;  %v1602_v40 = vcombine.high %v1592_v36, %v1600_v37 }
 0x489   : > { %v1650_v43 = vrot.slane %v1643_v38, %v5105_v33 }
 0x48a   : > { %v1657_v46 = vshrl.u32 %v1601_v39, 16  ;;  %v1665_v49 = vshrl.u32 %v1602_v40, 16 }
 0x48b   : > { %v1651_v44 = vcombine.low %v1642_v41, %v1650_v43  ;;  %v1652_v45 = vcombine.high %v1642_v41, %v1650_v43 }
 0x48d   : > { %v1655_v50 = vpack.i.b16 %v1651_v44, %v1601_v39  ;;  %v1658_v51 = vshrl.u32 %v1651_v44, 16  ;;  %v1663_v52 = vpack.i.b16 %v1652_v45, %v1602_v40  ;;  %v1666_v55 = vshrl.u32 %v1652_v45, 16 }
 0x48f   : > { %3988 = vmatpush3.bf16.msra.mxu0 %v1655_v50  ;;  %v1659_v56 = vpack.i.b16 %v1658_v51, %v1657_v46  ;;  %v1667_v57 = vpack.i.b16 %v1666_v55, %v1665_v49 }
 0x490   : > { %3999 = vmatprep.subr.bf16.mxu0 %v4656_v6 }
 0x491   : > { %3994 = vmatpush3.bf16.msra.mxu1 %v1659_v56 }
 0x492   : > { %4005 = vmatprep.subr.bf16.mxu1 %v4656_v6 }
 0x4f1   : > { %v1911_v58 = vpop.xlane.xlu1 %1910 }
 0x4f2   : > { %4329 = vrcp.f32 %v1911_v58 }
 0x4f3   : > { %v1914_v17 = vpop.xlane.xlu0 %1913 }
 0x4f4   : > { %4331 = vrcp.f32 %v1914_v17 }
 0x4f9   : > { %v1917_v60 = vpop.xlane.xlu0 %1916 }
 0x4fa   : > { %4333 = vrcp.f32 %v1917_v60 }
 0x4fc   : > { %v4330_v61 = vpop.eup %4329 }
 0x4fd   : > { %v1920_v62 = vpop.xlane.xlu0 %1919  ;;  %v1941_v1 = vmul.f32 %v4330_v61, %v5212_v59 }
 0x4fe   : > { %v4332_v0 = vpop.eup %4331  ;;  %4335 = vrcp.f32 %v1920_v62 }
 0x4ff   : > { %v1942_v2 = vmul.f32 %v4332_v0, %v5216_v63 }
 0x501   : > { %v1923_v3 = vpop.xlane.xlu1 %1922  ;;  %v1949_v4 = vpack.c.bf16 %v1942_v2, %v1941_v1 }
 0x502   : > { %4337 = vrcp.f32 %v1923_v3 }
 0x503   : > { %v1926_v5 = vpop.xlane.xlu0 %1925  ;;  %3990 = vmatmul.mubr.msk.bf16.vlgmr.msra.gmra.mrb[4].mxu0 %vm1860_vm2, %v1949_v4 }
 0x504   : > { %4339 = vrcp.f32 %v1926_v5  ;;  %4000 = vmatpush3.bf16.msra.mxu0 %v1663_v52  ;;  %4001 = vmatprep.mubr.msk.bf16.mxu0 %vm4658_vm0, %v4656_v6  ;;  %v4334_v9 = vpop.eup %4333 }
 0x505   : > { %4011 = vmatprep.subr.bf16.mxu0 %v4656_v6  ;;  %v1943_v11 = vmul.f32 %v4334_v9, %v5220_v7 }
 0x508   : > { %v4336_v10 = vpop.eup %4335 }
 0x509   : > { %v1944_v59 = vmul.f32 %v4336_v10, %v5224_v13  ;;  %v1929_v63 = vpop.xlane.xlu1 %1928 }
 0x50a   : > { %4341 = vrcp.f32 %v1929_v63 }
 0x50b   : > { %v1932_v12 = vpop.xlane.xlu0 %1931  ;;  %v1950_v14 = vpack.c.bf16 %v1944_v59, %v1943_v11 }
 0x50c   : > { %v4338_v15 = vpop.eup %4337  ;;  %4343 = vrcp.f32 %v1932_v12 }
 0x50d   : > { %3996 = vmatmul.mubr.msk.bf16.vlgmr.msra.gmra.mrb[20].mxu1 %vm1860_vm2, %v1950_v14  ;;  %v1945_v18 = vmul.f32 %v4338_v15, %v5230_v25  ;;  %v4221_v25 = vld [vmem:[%s4984_s4] sm:$0xff]  }
 0x50e   : > { %v4340_v16 = vpop.eup %4339  ;;  %4006 = vmatpush3.bf16.msra.mxu1 %v1667_v57  ;;  %4007 = vmatprep.mubr.msk.bf16.mxu1 %vm4658_vm0, %v4656_v6 }
 0x50f   : > { %v1946_v7 = vmul.f32 %v4340_v16, %v5234_v29  ;;  %v4222_v29 = vld [vmem:[%s4984_s4 + $0x8] sm:$0xff]  }
 0x511   : > { %v1951_v13 = vpack.c.bf16 %v1946_v7, %v1945_v18 }
 0x513   : > { %4002 = vmatmul.mubr.msk.bf16.vlgmr.msra.gmra.mrb[8].mxu0 %vm1860_vm2, %v1951_v13 }
 0x514   : > { %v4342_v19 = vpop.eup %4341  ;;  %4027 = vmatprep.mubr.msk.bf16.mxu0 %vm4658_vm0, %v4656_v6  ;;  %4012 = vmatpush3.bf16.msra.mxu0 %v4221_v25 }
 0x515   : > { %v1947_v21 = vmul.f32 %v4342_v19, %v5244_v42  ;;  %4013 = vmatprep.subr.bf16.mxu0 %v4656_v6  ;;  %v4224_v42 = vld [vmem:[%s4984_s4 + $0x18] sm:$0xff]  }
 0x516   : > { %v4344_v20 = vpop.eup %4343 }
 0x517   : > { %v1948_v22 = vmul.f32 %v4344_v20, %v5253_v53  ;;  %v4225_v53 = vld [vmem:[%s4984_s4 + $0x20] sm:$0xff]  }
 0x518   : > { %4014 = vmatpush3.bf16.msra.mxu0 %v4222_v29 }
 0x519   : > { %v1952_v24 = vpack.c.bf16 %v1948_v22, %v1947_v21  ;;  %4015 = vmatprep.subr.bf16.mxu0 %v4656_v6 }
 0x51b   : > { %4008 = vmatmul.mubr.msk.bf16.vlgmr.msra.gmra.mrb[24].mxu1 %vm1860_vm2, %v1952_v24 }
 0x51c   : > { %2830 = vmatprep.mubr.bf16.mxu1 %v4657_v28  ;;  %4016 = vmatpush3.bf16.msra.mxu0 %v4223_v26 }
 0x51d   : > { %4017 = vmatprep.subr.bf16.mxu0 %v4656_v6 }
 0x520   : > { %4018 = vmatpush3.bf16.msra.mxu0 %v4224_v42 }
 0x521   : > { %4019 = vmatprep.subr.bf16.mxu0 %v4656_v6 }
 0x524   : > { %4020 = vmatpush3.bf16.msra.mxu0 %v4225_v53 }
 0x525   : > { %4021 = vmatprep.subr.bf16.mxu0 %v4656_v6 }
 0x528   : > { %4022 = vmatpush3.bf16.msra.mxu0 %v4226_v27  ;;  %v4227_v27 = vld [vmem:[%s4984_s4 + $0x30] sm:$0xff]  }
 0x529   : > { %4023 = vmatprep.subr.bf16.mxu0 %v4656_v6 }
 0x52c   : > { %4024 = vmatpush3.bf16.msra.mxu0 %v4227_v27 }
 0x52d   : > { %4025 = vmatprep.subr.bf16.mxu0 %v4656_v6 }
 0x5d6   : > { %v1990_v30 = vpop.f32.mrb[4].mxu0 }
 0x5d7   : > { %v3991_v31 = vpop.f32.mrb[5].mxu0 }
 0x5d8   : > { %v1993_v32 = vpop.f32.mrb[6].mxu0 }
 0x5d9   : > { %v3992_v34 = vpop.f32.mrb[7].mxu0 }
 0x5e0   : > { %v2034_v35 = vpop.f32.mrb[20].mxu1 }
 0x5e1   : > { %v3997_v8 = vpop.f32.mrb[21].mxu1 }
 0x5e2   : > { %v2037_v36 = vpop.f32.mrb[22].mxu1 }
 0x5e3   : > { %v3998_v37 = vpop.f32.mrb[23].mxu1 }
 0x5e6   : > { %v2078_v38 = vpop.f32.mrb[8].mxu0 }
 0x5e7   : > { %v2129_v39 = vcombine.low %v1990_v30, %v2078_v38  ;;  %v2130_v40 = vcombine.high %v1990_v30, %v2078_v38  ;;  %v4003_v41 = vpop.f32.mrb[9].mxu0 }
 0x5e8   : > { %v2081_v43 = vpop.f32.mrb[10].mxu0 }
 0x5e9   : > { %v2197_v44 = vcombine.low %v1993_v32, %v2081_v43  ;;  %v2198_v45 = vcombine.high %v1993_v32, %v2081_v43  ;;  %v4004_v46 = vpop.f32.mrb[11].mxu0  ;;  %v2137_v55 = vrot.slane %v2129_v39, %v5100_v23  ;;  %v2144_v56 = vrot.slane %v2130_v40, %v5100_v23 }
 0x5eb   : > { %v2205_v4 = vrot.slane %v2197_v44, %v5100_v23  ;;  %v2212_v5 = vrot.slane %v2198_v45, %v5100_v23 }
 0x5ee   : > { %v2122_v49 = vpop.f32.mrb[24].mxu1 }
 0x5ef   : > { %v2145_v50 = vcombine.low %v2034_v35, %v2122_v49  ;;  %v2146_v51 = vcombine.high %v2034_v35, %v2122_v49  ;;  %v4009_v52 = vpop.f32.mrb[25].mxu1  ;;  %v4228_v49 = vld [vmem:[%s4984_s4 + $0x38] sm:$0xff]   ;;  %s5662_s4 = sld [smem:[#allocation34_spill]] (!%p3837_p7) }
 0x5f0   : > { %v2125_v57 = vpop.f32.mrb[26].mxu1  ;;  %4026 = vmatpush3.bf16.msra.mxu0 %v4228_v49  ;;  %v4241_v49 = vld [vmem:[%s5013_s18 + $0x40] ss:$16 sps:$4 sm:$0xff]  }
 0x5f1   : > { %v2153_v58 = vrot.slane %v2145_v50, %v5100_v23  ;;  %v2160_v17 = vrot.slane %v2146_v51, %v5100_v23  ;;  %v2213_v60 = vcombine.low %v2037_v36, %v2125_v57  ;;  %v2214_v61 = vcombine.high %v2037_v36, %v2125_v57  ;;  %v4010_v62 = vpop.f32.mrb[27].mxu1 }
 0x5f3   : > { %v2161_v0 = vcombine.low %v2137_v55, %v2153_v58  ;;  %v2162_v1 = vcombine.high %v2137_v55, %v2153_v58  ;;  %v2177_v2 = vcombine.low %v2144_v56, %v2160_v17  ;;  %v2178_v3 = vcombine.high %v2144_v56, %v2160_v17 }
 0x5f4   : > { %v2221_v9 = vrot.slane %v2213_v60, %v5100_v23  ;;  %v2228_v10 = vrot.slane %v2214_v61, %v5100_v23 }
 0x5f5   : > { %v2169_v11 = vrot.slane %v2161_v0, %v5105_v33  ;;  %v2176_v59 = vrot.slane %v2162_v1, %v5105_v33  ;;  %v2185_v63 = vrot.slane %v2177_v2, %v5105_v33  ;;  %v2192_v12 = vrot.slane %v2178_v3, %v5105_v33 }
 0x5f6   : > { %v2229_v14 = vcombine.low %v2205_v4, %v2221_v9  ;;  %v2230_v15 = vcombine.high %v2205_v4, %v2221_v9  ;;  %v2245_v16 = vcombine.low %v2212_v5, %v2228_v10  ;;  %v2246_v18 = vcombine.high %v2212_v5, %v2228_v10 }
 0x5f7   : > { %v2265_v7 = vcombine.low %v2169_v11, %v2176_v59  ;;  %v3761_v13 = vcombine.high %v2169_v11, %v2176_v59  ;;  %v2281_v19 = vcombine.low %v2185_v63, %v2192_v12  ;;  %v3762_v20 = vcombine.high %v2185_v63, %v2192_v12 }
 0x5f8   : > { %v2237_v21 = vrot.slane %v2229_v14, %v5105_v33  ;;  %v2244_v22 = vrot.slane %v2230_v15, %v5105_v33  ;;  %v2253_v24 = vrot.slane %v2245_v16, %v5105_v33  ;;  %v2260_v25 = vrot.slane %v2246_v18, %v5105_v33 }
 0x5f9   : > { %v2272_v29 = vrot.slane %v2265_v7, %v5100_v23  ;;  %v2280_v26 = vrot.slane %v3761_v13, %v5100_v23  ;;  %v2288_v42 = vrot.slane %v2281_v19, %v5100_v23  ;;  %v2296_v53 = vrot.slane %v3762_v20, %v5100_v23 }
 0x5fa   : > { %v2333_v30 = vcombine.low %v2237_v21, %v2244_v22  ;;  %v3763_v31 = vcombine.high %v2237_v21, %v2244_v22  ;;  %v2349_v32 = vcombine.low %v2253_v24, %v2260_v25  ;;  %v3764_v34 = vcombine.high %v2253_v24, %v2260_v25  ;;  %v4229_v22 = vld [vmem:[%s5013_s18] ss:$16 sps:$4 sm:$0xff]   ;;  %v4231_v24 = vld [vmem:[%s5013_s18 + $0x4] ss:$16 sps:$4 sm:$0xff]   ;;  %v4232_v25 = vld [vmem:[%s5013_s18 + $0x8] ss:$16 sps:$4 sm:$0xff]  }
 0x5fb   : > { %v2298_v35 = vcombine.high %v2272_v29, %v2280_v26  ;;  %v2314_v8 = vcombine.high %v2288_v42, %v2296_v53  ;;  %v2297_v36 = vcombine.low %v2272_v29, %v2280_v26  ;;  %v2313_v37 = vcombine.low %v2288_v42, %v2296_v53  ;;  %v4234_v29 = vld [vmem:[%s5013_s18 + $0xc] ss:$16 sps:$4 sm:$0xff]   ;;  %2798 = vmatprep.subr.bf16.mxu1 %v4231_v24  ;;  %v5359_v42 = vld [vmem:[%s5008_s6] sm:$0x3f] }
 0x5fc   : > { %v2340_v38 = vrot.slane %v2333_v30, %v5100_v23  ;;  %v2348_v39 = vrot.slane %v3763_v31, %v5100_v23  ;;  %v2356_v40 = vrot.slane %v2349_v32, %v5100_v23  ;;  %v2364_v41 = vrot.slane %v3764_v34, %v5100_v23  ;;  %2841 = vmatprep.subr.bf16.mxu0 %v4234_v29  ;;  %v4366_v32 = vld [vmem:[#allocation2] sm:$0xff] }
 0x5fd   : > { %v2312_v43 = vrot.slane %v2298_v35, %v5105_v33  ;;  %v2328_v44 = vrot.slane %v2314_v8, %v5105_v33  ;;  %v2305_v45 = vrot.slane %v2297_v36, %v5105_v33  ;;  %v2321_v46 = vrot.slane %v2313_v37, %v5105_v33  ;;  %2799 = vmatpush1.bf16.msra.mxu1 %v4229_v22  ;;  %v4367_v36 = vld [vmem:[#allocation2 + $0x8] sm:$0xff] }
 0x5fe   : > { %v2366_v50 = vcombine.high %v2340_v38, %v2348_v39  ;;  %v2382_v51 = vcombine.high %v2356_v40, %v2364_v41  ;;  %v2365_v52 = vcombine.low %v2340_v38, %v2348_v39  ;;  %v2381_v55 = vcombine.low %v2356_v40, %v2364_v41  ;;  %v4237_v40 = vld [vmem:[%s5013_s18 + $0x24] ss:$16 sps:$4 sm:$0xff]   ;;  %v4240_v41 = vld [vmem:[%s5013_s18 + $0x2c] ss:$16 sps:$4 sm:$0xff]  }
 0x5ff   : > { %v2331_v56 = vcombine.low %v2312_v43, %v2328_v44  ;;  %v2329_v57 = vcombine.low %v2305_v45, %v2321_v46  ;;  %v2330_v58 = vcombine.high %v2305_v45, %v2321_v46  ;;  %v2332_v17 = vcombine.high %v2312_v43, %v2328_v44  ;;  %v4235_v43 = vld [vmem:[%s5013_s18 + $0x20] ss:$16 sps:$4 sm:$0xff]   ;;  %v4238_v44 = vld [vmem:[%s5013_s18 + $0x28] ss:$16 sps:$4 sm:$0xff]   ;;  %2800 = vmatprep.subr.bf16.mxu1 %v4237_v40  ;;  %v4243_v45 = vld [vmem:[%s5013_s18 + $0x44] ss:$16 sps:$4 sm:$0xff]  }
 0x600   : > { %v2380_v6 = vrot.slane %v2366_v50, %v5105_v33  ;;  %v2396_v23 = vrot.slane %v2382_v51, %v5105_v33  ;;  %v2373_v60 = vrot.slane %v2365_v52, %v5105_v33  ;;  %v2389_v61 = vrot.slane %v2381_v55, %v5105_v33  ;;  %v4246_v46 = vld [vmem:[%s5013_s18 + $0x4c] ss:$16 sps:$4 sm:$0xff]   ;;  %v4244_v50 = vld [vmem:[%s5013_s18 + $0x48] ss:$16 sps:$4 sm:$0xff]   ;;  %v4249_v51 = vld [vmem:[%s5013_s18 + $0x64] ss:$16 sps:$4 sm:$0xff]  }
 0x601   : > { %v2452_v26 = vsub.s32 2, %v5070_v47  ;;  %2801 = vmatpush1.bf16.msra.mxu1 %v4235_v43  ;;  %v4252_v52 = vld [vmem:[%s5013_s18 + $0x6c] ss:$16 sps:$4 sm:$0xff]   ;;  %v4247_v55 = vld [vmem:[%s5013_s18 + $0x60] ss:$16 sps:$4 sm:$0xff]   ;;  %v2573_v22 = vsub.s32 3, %v5070_v47 }
 0x602   : > { %v2399_v62 = vcombine.low %v2380_v6, %v2396_v23  ;;  %v2398_v0 = vcombine.high %v2373_v60, %v2389_v61  ;;  %v2397_v1 = vcombine.low %v2373_v60, %v2389_v61  ;;  %v2400_v2 = vcombine.high %v2380_v6, %v2396_v23  ;;  %2802 = vmatprep.subr.bf16.mxu1 %v4243_v45  ;;  %v4258_v6 = vld [vmem:[%s5013_s18 + $0x8c] ss:$16 sps:$4 sm:$0xff]   ;;  %v4261_v23 = vld [vmem:[%s5013_s18 + $0xa4] ss:$16 sps:$4 sm:$0xff]   ;;  %v4259_v61 = vld [vmem:[%s5013_s18 + $0xa0] ss:$16 sps:$4 sm:$0xff]  }
 0x603   : > { %v2453_v53 = vrot.slane %v5359_v42, %v2452_v26  ;;  %v4264_v60 = vld [vmem:[%s5013_s18 + $0xac] ss:$16 sps:$4 sm:$0xff]   ;;  %v2579_v29 = vsub.s32 4, %v5070_v47  ;;  %v4277_v40 = vld [vmem:[%s4990_s24 + $0x40] sm:$0xff]  }
 0x604   : > { %v4179_v3 = vpack.i.bf16 %v2399_v62, %v2331_v56  ;;  %v4174_v4 = vpack.i.bf16 %v2398_v0, %v2330_v58  ;;  %v4184_v5 = vpack.i.bf16 %v2400_v2, %v2332_v17  ;;  %v4250_v56 = vld [vmem:[%s5013_s18 + $0x68] ss:$16 sps:$4 sm:$0xff]   ;;  %v4255_v58 = vld [vmem:[%s5013_s18 + $0x84] ss:$16 sps:$4 sm:$0xff]   ;;  %v4265_v2 = vld [vmem:[%s5013_s18 + $0xc0] ss:$16 sps:$4 sm:$0xff]  }
 0x605   : > { %2803 = vmatpush1.bf16.msra.mxu1 %v4241_v49  ;;  %v4256_v17 = vld [vmem:[%s5013_s18 + $0x88] ss:$16 sps:$4 sm:$0xff]   ;;  %v4267_v0 = vld [vmem:[%s5013_s18 + $0xc4] ss:$16 sps:$4 sm:$0xff]  }
 0x606   : > { %4180 = vrot.lane.b32.xlu0 %v4179_v3, %s4659_s3  ;;  %4175 = vrot.lane.b32.xlu1 %v4174_v4, %s4661_s29  ;;  %v4262_v62 = vld [vmem:[%s5013_s18 + $0xa8] ss:$16 sps:$4 sm:$0xff]   ;;  %v4273_v4 = vld [vmem:[%s5013_s18 + $0xe4] ss:$16 sps:$4 sm:$0xff]  }
 0x607   : > { %2804 = vmatprep.subr.bf16.mxu1 %v4249_v51  ;;  %v4268_v3 = vld [vmem:[%s5013_s18 + $0xc8] ss:$16 sps:$4 sm:$0xff]   ;;  %v4279_v43 = vld [vmem:[%s4990_s24] sm:$0xff]   ;;  %v4285_v51 = vld [vmem:[%s4990_s24 + $0x50] sm:$0xff]  }
 0x608   : > { %v4281_v45 = vld [vmem:[%s4990_s24 + $0x48] sm:$0xff]  }
 0x609   : > { %2805 = vmatpush1.bf16.msra.mxu1 %v4247_v55  ;;  %v4283_v49 = vld [vmem:[%s4990_s24 + $0x8] sm:$0xff]   ;;  %v4287_v55 = vld [vmem:[%s4990_s24 + $0x10] sm:$0xff]  }
 0x60a   : > { %4185 = vrot.lane.b32.xlu1 %v4184_v5, %s4660_s25  ;;  %2806 = vmatprep.subr.bf16.mxu1 %v4255_v58  ;;  %v4276_v5 = vld [vmem:[%s5013_s18 + $0xec] ss:$16 sps:$4 sm:$0xff]  }
 0x60b   : > { %v4290_v58 = vld [vmem:[%s4990_s24 + $0xd8] sm:$0xff]  }
 0x678   : > { %v4181_v9 = vpop.permute.xlu0 %4180  ;;  %v4176_v10 = vpop.permute.xlu1 %4175 }
 0x679   : > { %v4178_v11 = vunpack.i.h.bf16 %v4176_v10  ;;  %v4177_v59 = vunpack.i.l.bf16 %v4176_v10  ;;  %v4183_v63 = vunpack.i.h.bf16 %v4181_v9  ;;  %v4182_v33 = vunpack.i.l.bf16 %v4181_v9  ;;  %v4271_v9 = vld [vmem:[%s5013_s18 + $0xe0] ss:$16 sps:$4 sm:$0xff]   ;;  %v4274_v10 = vld [vmem:[%s5013_s18 + $0xe8] ss:$16 sps:$4 sm:$0xff]  }
 0x67b   : > { %v2425_v12 = vsel %vm1671_vm1, %v2329_v57, %v4177_v59  ;;  %v2426_v14 = vsel %vm1671_vm1, %v2397_v1, %v4178_v11  ;;  %v4253_v57 = vld [vmem:[%s5013_s18 + $0x80] ss:$16 sps:$4 sm:$0xff]   ;;  %v4270_v1 = vld [vmem:[%s5013_s18 + $0xcc] ss:$16 sps:$4 sm:$0xff]  }
 0x67c   : > { %v4186_v15 = vpop.permute.xlu1 %4185  ;;  %v2428_v7 = vsel %vm2427_vm3, %v2425_v12, %v4182_v33  ;;  %v2429_v13 = vsel %vm2427_vm3, %v2426_v14, %v4183_v63  ;;  %2807 = vmatpush1.bf16.msra.mxu1 %v4253_v57  ;;  %v4289_v57 = vld [vmem:[%s4990_s24 + $0x58] sm:$0xff]  }
 0x67d   : > { %v4188_v16 = vunpack.i.h.bf16 %v4186_v15  ;;  %v4187_v18 = vunpack.i.l.bf16 %v4186_v15  ;;  %2808 = vmatprep.subr.bf16.mxu1 %v4261_v23  ;;  %v4293_v23 = vld [vmem:[%s4990_s24 + $0x60] sm:$0xff]  }
 0x67f   : > { %v2431_v19 = vsel %vm2430_vm4, %v2428_v7, %v4187_v18  ;;  %v2432_v20 = vsel %vm2430_vm4, %v2429_v13, %v4188_v16 }
 0x680   : > { %v2433_v21 = vpack.c.bf16 %v2432_v20, %v2431_v19  ;;  %2809 = vmatpush1.bf16.msra.mxu1 %v4259_v61  ;;  %v4295_v61 = vld [vmem:[%s4990_s24 + $0x20] sm:$0xff]  }
 0x681   : > { %2810 = vmatprep.subr.bf16.mxu1 %v4267_v0  ;;  %v4297_v0 = vld [vmem:[%s4990_s24 + $0x68] sm:$0xff]  }
 0x682   : > { %4028 = vmatmul.mubr.bf16.vlgmr.msra.gmra.mrb[12].mxu0 %v2433_v21 }
 0x683   : > { %2873 = vmatprep.mubr.bf16.mxu0 %v4657_v28  ;;  %2842 = vmatpush1.bf16.msra.mxu0 %v4232_v25  ;;  %v2574_v25 = vrot.slane %v5359_v42, %v2573_v22 }
 0x684   : > { %2843 = vmatprep.subr.bf16.mxu0 %v4240_v41  ;;  %2811 = vmatpush1.bf16.msra.mxu1 %v4265_v2  ;;  %v4278_v41 = vld [vmem:[%s4990_s24 + $0xc0] sm:$0xff]   ;;  %v4299_v2 = vld [vmem:[%s4990_s24 + $0x28] sm:$0xff]  }
 0x685   : > { %2812 = vmatprep.subr.bf16.mxu1 %v4273_v4  ;;  %v4301_v4 = vld [vmem:[%s4990_s24 + $0x70] sm:$0xff]  }
 0x687   : > { %2844 = vmatpush1.bf16.msra.mxu0 %v4238_v44  ;;  %v4280_v44 = vld [vmem:[%s4990_s24 + $0x80] sm:$0xff]  }
 0x688   : > { %2845 = vmatprep.subr.bf16.mxu0 %v4246_v46  ;;  %2813 = vmatpush1.bf16.msra.mxu1 %v4271_v9  ;;  %v4282_v46 = vld [vmem:[%s4990_s24 + $0xc8] sm:$0xff]   ;;  %v4303_v9 = vld [vmem:[%s4990_s24 + $0x30] sm:$0xff]  }
 0x689   : > { %3899 = vmatprep.subr.bf16.mxu1 %v4277_v40 }
 0x68b   : > { %2846 = vmatpush1.bf16.msra.mxu0 %v4244_v50  ;;  %v4284_v50 = vld [vmem:[%s4990_s24 + $0x88] sm:$0xff]  }
 0x68c   : > { %2847 = vmatprep.subr.bf16.mxu0 %v4252_v52  ;;  %v4286_v52 = vld [vmem:[%s4990_s24 + $0xd0] sm:$0xff]  }
 0x68f   : > { %2848 = vmatpush1.bf16.msra.mxu0 %v4250_v56  ;;  %v4288_v56 = vld [vmem:[%s4990_s24 + $0x90] sm:$0xff]  }
 0x690   : > { %2849 = vmatprep.subr.bf16.mxu0 %v4258_v6  ;;  %v4292_v6 = vld [vmem:[%s4990_s24 + $0x98] sm:$0xff]  }
 0x693   : > { %2850 = vmatpush1.bf16.msra.mxu0 %v4256_v17  ;;  %v4291_v17 = vld [vmem:[%s4990_s24 + $0x18] sm:$0xff]  }
 0x694   : > { %2851 = vmatprep.subr.bf16.mxu0 %v4264_v60  ;;  %v4294_v60 = vld [vmem:[%s4990_s24 + $0xe0] sm:$0xff]  }
 0x697   : > { %2852 = vmatpush1.bf16.msra.mxu0 %v4262_v62  ;;  %v4296_v62 = vld [vmem:[%s4990_s24 + $0xa0] sm:$0xff]  }
 0x698   : > { %2853 = vmatprep.subr.bf16.mxu0 %v4270_v1  ;;  %v4298_v1 = vld [vmem:[%s4990_s24 + $0xe8] sm:$0xff]  }
 0x69b   : > { %2854 = vmatpush1.bf16.msra.mxu0 %v4268_v3  ;;  %v4300_v3 = vld [vmem:[%s4990_s24 + $0xa8] sm:$0xff]  }
 0x69c   : > { %2855 = vmatprep.subr.bf16.mxu0 %v4276_v5  ;;  %v4302_v5 = vld [vmem:[%s4990_s24 + $0xf0] sm:$0xff]  }
 0x69f   : > { %2856 = vmatpush1.bf16.msra.mxu0 %v4274_v10  ;;  %v4304_v10 = vld [vmem:[%s4990_s24 + $0xb0] sm:$0xff]  }
 0x6a0   : > { %3921 = vmatprep.subr.bf16.mxu0 %v4278_v41 }
 0x755   : > { %v2536_v27 = vpop.f32.mrb[12].mxu0 }
 0x756   : > { %v2537_v30 = vadd.f32 %v2536_v27, %v2453_v53  ;;  %v4029_v28 = vpop.f32.mrb[13].mxu0 }
 0x757   : > { %v2539_v31 = vpop.f32.mrb[14].mxu0 }
 0x758   : > { %v5364_v34 = vadd.f32 %v4366_v32, %v2537_v30  ;;  %v2540_v35 = vadd.f32 %v2539_v31, %v2453_v53  ;;  %v4030_v8 = vpop.f32.mrb[15].mxu0 }
 0x75a   : > { %v5366_v37 = vadd.f32 %v4367_v36, %v2540_v35  ;;  %2545 = vadd.xlane.f32.xlu1 %v5364_v34  ;;  %v2551_v39 = vmul.f32 %v5364_v34, %v5364_v34  ;;  %v2580_v35 = vrot.slane %v5359_v42, %v2579_v29 }
 0x75c   : > { %2547 = vadd.xlane.f32.xlu0 %v5366_v37  ;;  %v2552_v38 = vmul.f32 %v5366_v37, %v5366_v37 }
 0x75e   : > { %2555 = vadd.xlane.f32.xlu1 %v2552_v38 }
 0x760   : > { %2553 = vadd.xlane.f32.xlu0 %v2551_v39 }
 0x7e7   : > { %v2546_v11 = vpop.xlane.xlu1 %2545 }
 0x7e8   : > { %v2549_v63 = vmul.f32 0.0078125, %v2546_v11  ;;  %v4305_v11 = vld [vmem:[%s4990_s24 + $0x78] sm:$0xff]  }
 0x7e9   : > { %v2548_v59 = vpop.xlane.xlu0 %2547 }
 0x7ea   : > { %v2550_v33 = vmul.f32 0.0078125, %v2548_v59  ;;  %v2559_v18 = vmul.f32 %v2549_v63, %v2549_v63  ;;  %v2563_v27 = vsub.f32 %v5364_v34, %v2549_v63  ;;  %v4306_v59 = vld [vmem:[%s4990_s24 + $0xf8] sm:$0xff]  }
 0x7eb   : > { %v2556_v12 = vpop.xlane.xlu1 %2555  ;;  %v4307_v63 = vld [vmem:[%s4990_s24 + $0x38] sm:$0xff]  }
 0x7ec   : > { %v2560_v14 = vmul.f32 %v2550_v33, %v2550_v33  ;;  %v2558_v15 = vmul.f32 0.0078125, %v2556_v12  ;;  %v2564_v24 = vsub.f32 %v5366_v37, %v2550_v33  ;;  %v4308_v33 = vld [vmem:[%s4990_s24 + $0xb8] sm:$0xff]   ;;  %v2616_v12 = vld [vmem:[%s5018_s7] sm:$0xf] }
 0x7ed   : > { %v2554_v16 = vpop.xlane.xlu0 %2553 }
 0x7ee   : > { %v2562_v7 = vsub.f32 %v2558_v15, %v2560_v14  ;;  %v2557_v13 = vmul.f32 0.0078125, %v2554_v16  ;;  %v2621_v14 = vrot.slane %v2616_v12, %v5073_v48  ;;  %v2629_v15 = vrot.slane %v2616_v12, %v2452_v26 }
 0x7ef   : > { %v2625_v16 = vrot.slane %v2616_v12, %v5079_v54 }
 0x7f0   : > { %v2566_v19 = vadd.f32 1e-05, %v2562_v7  ;;  %v2561_v20 = vsub.f32 %v2557_v13, %v2559_v18  ;;  %v2633_v18 = vrot.slane %v2616_v12, %v2573_v22 }
 0x7f2   : > { %4345 = vrsqrt.f32 %v2566_v19  ;;  %v2565_v21 = vadd.f32 1e-05, %v2561_v20 }
 0x7f4   : > { %4347 = vrsqrt.f32 %v2565_v21 }
 0x7fc   : > { %v4346_v53 = vpop.eup %4345 }
 0x7fd   : > { %v2570_v30 = vmul.f32 %v4346_v53, %v2564_v24 }
 0x7fe   : > { %v4348_v28 = vpop.eup %4347 }
 0x7ff   : > { %v2569_v31 = vmul.f32 %v4348_v28, %v2563_v27  ;;  %v2576_v32 = vmul.f32 %v2574_v25, %v2570_v30 }
 0x801   : > { %v2575_v8 = vmul.f32 %v2574_v25, %v2569_v31  ;;  %v2582_v38 = vadd.f32 %v2580_v35, %v2576_v32 }
 0x803   : > { %v2581_v36 = vadd.f32 %v2580_v35, %v2575_v8 }
 0x805   : > { %v2583_v39 = vpack.c.bf16 %v2582_v38, %v2581_v36 }
 0x807   : > { %2831 = vmatmul.mubr.bf16.vlgmr.msra.gmra.mrb[28].mxu1 %v2583_v39  ;;  %2874 = vmatmul.mubr.bf16.vlgmr.msra.gmra.mrb[16].mxu0 %v2583_v39 }
 0x808   : > { %3900 = vmatpush3.bf16.msra.mxu1 %v4279_v43  ;;  %3922 = vmatpush3.bf16.msra.mxu0 %v4280_v44 }
 0x809   : > { %3901 = vmatprep.subr.bf16.mxu1 %v4281_v45  ;;  %3923 = vmatprep.subr.bf16.mxu0 %v4282_v46 }
 0x80c   : > { %3902 = vmatpush3.bf16.msra.mxu1 %v4283_v49  ;;  %3924 = vmatpush3.bf16.msra.mxu0 %v4284_v50 }
 0x80d   : > { %3903 = vmatprep.subr.bf16.mxu1 %v4285_v51  ;;  %3925 = vmatprep.subr.bf16.mxu0 %v4286_v52 }
 0x810   : > { %3904 = vmatpush3.bf16.msra.mxu1 %v4287_v55  ;;  %3926 = vmatpush3.bf16.msra.mxu0 %v4288_v56 }
 0x811   : > { %3905 = vmatprep.subr.bf16.mxu1 %v4289_v57  ;;  %3927 = vmatprep.subr.bf16.mxu0 %v4290_v58 }
 0x814   : > { %3906 = vmatpush3.bf16.msra.mxu1 %v4291_v17  ;;  %3928 = vmatpush3.bf16.msra.mxu0 %v4292_v6 }
 0x815   : > { %3907 = vmatprep.subr.bf16.mxu1 %v4293_v23  ;;  %3929 = vmatprep.subr.bf16.mxu0 %v4294_v60 }
 0x818   : > { %3908 = vmatpush3.bf16.msra.mxu1 %v4295_v61  ;;  %3930 = vmatpush3.bf16.msra.mxu0 %v4296_v62 }
 0x819   : > { %3909 = vmatprep.subr.bf16.mxu1 %v4297_v0  ;;  %3931 = vmatprep.subr.bf16.mxu0 %v4298_v1 }
 0x81c   : > { %3910 = vmatpush3.bf16.msra.mxu1 %v4299_v2  ;;  %3932 = vmatpush3.bf16.msra.mxu0 %v4300_v3 }
 0x81d   : > { %3911 = vmatprep.subr.bf16.mxu1 %v4301_v4  ;;  %3933 = vmatprep.subr.bf16.mxu0 %v4302_v5 }
 0x820   : > { %3912 = vmatpush3.bf16.msra.mxu1 %v4303_v9  ;;  %3934 = vmatpush3.bf16.msra.mxu0 %v4304_v10 }
 0x821   : > { %3913 = vmatprep.subr.bf16.mxu1 %v4305_v11  ;;  %3935 = vmatprep.subr.bf16.mxu0 %v4306_v59 }
 0x824   : > { %3914 = vmatpush3.bf16.msra.mxu1 %v4307_v63  ;;  %3936 = vmatpush3.bf16.msra.mxu0 %v4308_v33 }
 0x8da   : > { %v2832_v7 = vpop.f32.mrb[28].mxu1  ;;  %v2875_v13 = vpop.f32.mrb[16].mxu0 }
 0x8db   : > { %v5449_v19 = vadd.f32 %v2832_v7, %v2621_v14  ;;  %v5451_v20 = vadd.f32 %v2875_v13, %v2629_v15  ;;  %v2834_v21 = vpop.f32.mrb[29].mxu1  ;;  %v2877_v24 = vpop.f32.mrb[17].mxu0 }
 0x8dc   : > { %v5453_v25 = vadd.f32 %v2834_v21, %v2625_v16  ;;  %v5455_v29 = vadd.f32 %v2877_v24, %v2633_v18  ;;  %v2836_v53 = vpop.f32.mrb[30].mxu1  ;;  %v2879_v27 = vpop.f32.mrb[18].mxu0 }
 0x8dd   : > { %v2892_v26 = vmul.f32 %v5449_v19, %v5449_v19  ;;  %v2894_v22 = vmul.f32 %v5451_v20, %v5451_v20  ;;  %v2838_v30 = vpop.f32.mrb[31].mxu1  ;;  %v2881_v28 = vpop.f32.mrb[19].mxu0  ;;  %v2837_v35 = vadd.f32 %v2836_v53, %v2621_v14  ;;  %v2880_v8 = vadd.f32 %v2879_v27, %v2629_v15 }
 0x8de   : > { %v2893_v31 = vmul.f32 %v5453_v25, %v5453_v25  ;;  %v2895_v32 = vmul.f32 %v5455_v29, %v5455_v29  ;;  %v2839_v39 = vadd.f32 %v2838_v30, %v2625_v16  ;;  %v5467_v40 = vadd.f32 %v2881_v28, %v2633_v18 }
 0x8df   : > { %v2900_v36 = vmul.f32 %v2892_v26, %v5449_v19  ;;  %v2902_v38 = vmul.f32 %v2894_v22, %v5451_v20  ;;  %v2896_v44 = vmul.f32 %v2837_v35, %v2837_v35  ;;  %v2898_v49 = vmul.f32 %v2880_v8, %v2880_v8 }
 0x8e0   : > { %v2901_v41 = vmul.f32 %v2893_v31, %v5453_v25  ;;  %v2903_v43 = vmul.f32 %v2895_v32, %v5455_v29  ;;  %v2897_v55 = vmul.f32 %v2839_v39, %v2839_v39  ;;  %v2899_v17 = vmul.f32 %v5467_v40, %v5467_v40 }
 0x8e1   : > { %v2908_v45 = vmul.f32 0.044715, %v2900_v36  ;;  %v2910_v46 = vmul.f32 0.044715, %v2902_v38  ;;  %v2904_v52 = vmul.f32 %v2896_v44, %v2837_v35  ;;  %v2906_v58 = vmul.f32 %v2898_v49, %v2880_v8 }
 0x8e2   : > { %v2909_v50 = vmul.f32 0.044715, %v2901_v41  ;;  %v2911_v51 = vmul.f32 0.044715, %v2903_v43  ;;  %v2905_v61 = vmul.f32 %v2897_v55, %v2839_v39  ;;  %v2907_v2 = vmul.f32 %v2899_v17, %v5467_v40 }
 0x8e3   : > { %v2916_v56 = vadd.f32 %v2908_v45, %v5449_v19  ;;  %v2918_v57 = vadd.f32 %v2910_v46, %v5451_v20  ;;  %v2912_v60 = vmul.f32 0.044715, %v2904_v52  ;;  %v2914_v1 = vmul.f32 0.044715, %v2906_v58 }
 0x8e4   : > { %v2917_v6 = vadd.f32 %v2909_v50, %v5453_v25  ;;  %v2919_v23 = vadd.f32 %v2911_v51, %v5455_v29  ;;  %v2913_v9 = vmul.f32 0.044715, %v2905_v61  ;;  %v2915_v11 = vmul.f32 0.044715, %v2907_v2 }
 0x8e5   : > { %v2924_v62 = vmul.f32 0.7978846, %v2916_v56  ;;  %v2926_v0 = vmul.f32 0.7978846, %v2918_v57  ;;  %v2920_v5 = vadd.f32 %v2912_v60, %v2837_v35  ;;  %v2922_v10 = vadd.f32 %v2914_v1, %v2880_v8 }
 0x8e6   : > { %v2925_v3 = vmul.f32 0.7978846, %v2917_v6  ;;  %v2927_v4 = vmul.f32 0.7978846, %v2919_v23  ;;  %v2921_v63 = vadd.f32 %v2913_v9, %v2839_v39  ;;  %v2923_v12 = vadd.f32 %v2915_v11, %v5467_v40 }
 0x8e7   : > { %4349 = vtanh.f32 %v2924_v62  ;;  %v2928_v59 = vmul.f32 0.7978846, %v2920_v5  ;;  %v2930_v33 = vmul.f32 0.7978846, %v2922_v10  ;;  %v2884_v53 = vmul.f32 0.5, %v5449_v19 }
 0x8e8   : > { %4351 = vtanh.f32 %v2926_v0  ;;  %v2929_v14 = vmul.f32 0.7978846, %v2921_v63  ;;  %v2931_v15 = vmul.f32 0.7978846, %v2923_v12  ;;  %v2886_v27 = vmul.f32 0.5, %v5451_v20 }
 0x8e9   : > { %4353 = vtanh.f32 %v2925_v3  ;;  %v2888_v30 = vmul.f32 0.5, %v2837_v35  ;;  %v2890_v28 = vmul.f32 0.5, %v2880_v8  ;;  %v2885_v38 = vmul.f32 0.5, %v5453_v25  ;;  %v4368_v12 = vld [vmem:[#allocation9 + $0x4] ss:$8 sps:$4 sm:$0xff] (!%p3837_p7)  }
 0x8ea   : > { %4355 = vtanh.f32 %v2927_v4  ;;  %v2889_v41 = vmul.f32 0.5, %v2839_v39  ;;  %v2887_v49 = vmul.f32 0.5, %v5455_v29  ;;  %v2891_v20 = vmul.f32 0.5, %v5467_v40  ;;  %3446 = vmatprep.subr.bf16.mxu0 (!%p3837_p7), %v4368_v12 }
 0x8eb   : > { %4357 = vtanh.f32 %v2928_v59  ;;  %v3026_v29 = vsub.s32 5, %v5070_v47 }
 0x8ec   : > { %4359 = vtanh.f32 %v2930_v33 }
 0x8ed   : > { %4361 = vtanh.f32 %v2929_v14  ;;  %v3027_v40 = vrot.slane %v5359_v42, %v3026_v29  ;;  %v4371_v14 = vld [vmem:[#allocation9 + $0x14] ss:$8 sps:$4 sm:$0xff] (!%p3837_p7)  }
 0x8ee   : > { %4363 = vtanh.f32 %v2931_v15  ;;  %v4373_v15 = vld [vmem:[#allocation9 + $0x10] ss:$8 sps:$4 sm:$0xff] (!%p3837_p7)  }
 0x8f1   : > { %v4350_v16 = vpop.eup %4349 }
 0x8f2   : > { %v4352_v18 = vpop.eup %4351  ;;  %v2940_v21 = vadd.f32 1.0, %v4350_v16  ;;  %v4374_v16 = vld [vmem:[#allocation9 + $0x24] ss:$8 sps:$4 sm:$0xff] (!%p3837_p7)  }
 0x8f3   : > { %v4354_v7 = vpop.eup %4353  ;;  %v2942_v26 = vadd.f32 1.0, %v4352_v18  ;;  %v4376_v18 = vld [vmem:[#allocation9 + $0x20] ss:$8 sps:$4 sm:$0xff] (!%p3837_p7)  }
 0x8f4   : > { %v4356_v13 = vpop.eup %4355  ;;  %v2941_v31 = vadd.f32 1.0, %v4354_v7  ;;  %v2948_v50 = vmul.f32 %v2940_v21, %v2884_v53  ;;  %v4377_v7 = vld [vmem:[#allocation9 + $0x34] ss:$8 sps:$4 sm:$0xff] (!%p3837_p7)   ;;  %v4380_v21 = vld [vmem:[#allocation9 + $0x44] ss:$8 sps:$4 sm:$0xff] (!%p3837_p7)  }
 0x8f5   : > { %v4358_v24 = vpop.eup %4357  ;;  %v2943_v43 = vadd.f32 1.0, %v4356_v13  ;;  %v2950_v52 = vmul.f32 %v2942_v26, %v2886_v27  ;;  %v4379_v13 = vld [vmem:[#allocation9 + $0x30] ss:$8 sps:$4 sm:$0xff] (!%p3837_p7)   ;;  %v4383_v53 = vld [vmem:[#allocation9 + $0x54] ss:$8 sps:$4 sm:$0xff] (!%p3837_p7)   ;;  %v4664_v27 = vmov (!%p3837_p7), 0  }
 0x8f6   : > { %v4360_v22 = vpop.eup %4359  ;;  %v2944_v32 = vadd.f32 1.0, %v4358_v24  ;;  %v2949_v8 = vmul.f32 %v2941_v31, %v2885_v38  ;;  %v4382_v24 = vld [vmem:[#allocation9 + $0x40] ss:$8 sps:$4 sm:$0xff] (!%p3837_p7)   ;;  %v4385_v26 = vld [vmem:[#allocation9 + $0x50] ss:$8 sps:$4 sm:$0xff] (!%p3837_p7)  }
 0x8f7   : > { %v4362_v36 = vpop.eup %4361  ;;  %v2946_v44 = vadd.f32 1.0, %v4360_v22  ;;  %v2951_v57 = vmul.f32 %v2943_v43, %v2887_v49  ;;  %v4386_v22 = vld [vmem:[#allocation9 + $0x64] ss:$8 sps:$4 sm:$0xff] (!%p3837_p7)   ;;  %v4391_v31 = vld [vmem:[#allocation9 + $0x70] ss:$8 sps:$4 sm:$0xff] (!%p3837_p7)  }
 0x8f8   : > { %v4364_v45 = vpop.eup %4363  ;;  %v2945_v46 = vadd.f32 1.0, %v4362_v36  ;;  %v2952_v19 = vmul.f32 %v2944_v32, %v2888_v30  ;;  %v4388_v30 = vld [vmem:[#allocation9 + $0x60] ss:$8 sps:$4 sm:$0xff] (!%p3837_p7)  }
 0x8f9   : > { %v2947_v51 = vadd.f32 1.0, %v4364_v45  ;;  %v2954_v35 = vmul.f32 %v2946_v44, %v2890_v28  ;;  %v4389_v28 = vld [vmem:[#allocation9 + $0x74] ss:$8 sps:$4 sm:$0xff] (!%p3837_p7)  }
 0x8fa   : > { %v2953_v55 = vmul.f32 %v2945_v46, %v2889_v41  ;;  %v2956_v56 = vpack.c.bf16 %v2952_v19, %v2948_v50 }
 0x8fb   : > { %v2955_v58 = vmul.f32 %v2947_v51, %v2891_v20  ;;  %v2958_v25 = vpack.c.bf16 %v2954_v35, %v2950_v52  ;;  %v3310_v35 = vld [vmem:[%s5662_s4] sm:$0x3] (!%p3837_p7) }
 0x8fc   : > { %v2957_v39 = vpack.c.bf16 %v2953_v55, %v2949_v8  ;;  %v3346_v29 = vrot.slane (!%p3837_p7), %v3310_v35, %v5079_v54 }
 0x8fd   : > { %v2959_v17 = vpack.c.bf16 %v2955_v58, %v2951_v57  ;;  %v3340_v57 = vrot.slane (!%p3837_p7), %v3310_v35, %v5073_v48 }
 0x8fe   : > { %3252 = vmatprep.mubr.bf16.mxu1 %v2957_v39 }
 0x8ff   : > { %3293 = vmatprep.mubr.bf16.mxu0 %v2959_v17  ;;  %3253 = vmatmul.mubr.bf16.vlgmr.msra.gmra.mrb[32].mxu1 %v2956_v56 }
 0x900   : > { %3294 = vmatmul.mubr.bf16.vlgmr.msra.gmra.mrb[20].mxu0 %v2958_v25 }
 0x901   : > { %3478 = vmatprep.mubr.bf16.mxu0 (!%p3837_p7), %v4664_v27 }
 0x9d2   : > { %v3915_v6 = vpop.f32.mrb[32].mxu1 }
 0x9d3   : > { %v3937_v23 = vpop.f32.mrb[20].mxu0  ;;  %v3916_v60 = vpop.f32.mrb[33].mxu1 }
 0x9d4   : > { %v3917_v61 = vadd.f32 %v3916_v60, %v3915_v6  ;;  %v3938_v62 = vpop.f32.mrb[21].mxu0  ;;  %v3918_v0 = vpop.f32.mrb[34].mxu1 }
 0x9d5   : > { %v3939_v1 = vadd.f32 %v3938_v62, %v3937_v23  ;;  %v3940_v2 = vpop.f32.mrb[22].mxu0  ;;  %v3919_v3 = vpop.f32.mrb[35].mxu1 }
 0x9d6   : > { %v3255_v4 = vadd.f32 %v3917_v61, %v3027_v40  ;;  %v3920_v5 = vadd.f32 %v3919_v3, %v3918_v0  ;;  %v3941_v9 = vpop.f32.mrb[23].mxu0 }
 0x9d7   : > { %v3942_v10 = vadd.f32 %v3941_v9, %v3940_v2 }
 0x9d8   : > { %v3296_v11 = vadd.f32 %v3939_v1, %v3255_v4  ;;  %v3258_v59 = vadd.f32 %v3920_v5, %v3027_v40  ;;  %3309 = sbr.rel (%p3837_p7) target bundleno = 2913 (0xb61), region = 84 }
 0x9da   : > { %v5487_v63 = vadd.f32 %v3296_v11, %v5364_v34  ;;  %v3299_v47 = vadd.f32 %v3942_v10, %v3258_v59 }
 0x9dc   : > { %3304 = vst [vmem:[#allocation2] sm:$0xff] %v5487_v63  ;;  %v5491_v42 = vadd.f32 %v3299_v47, %v5366_v37  ;;  %3311 = vadd.xlane.f32.xlu0 (!%p3837_p7), %v5487_v63  ;;  %v3317_v33 = vmul.f32 (!%p3837_p7), %v5487_v63, %v5487_v63  ;;  %v4370_v37 = vld [vmem:[#allocation9] ss:$8 sps:$4 sm:$0xff] (!%p3837_p7)  }
 0x9dd   : > { %3447 = vmatpush1.bf16.msra.mxu0 (!%p3837_p7), %v4370_v37 }
 0x9de   : > { %3305 = vst [vmem:[#allocation2 + $0x8] sm:$0xff] %v5491_v42  ;;  %3319 = vadd.xlane.f32.xlu1 (!%p3837_p7), %v3317_v33  ;;  %v3318_v34 = vmul.f32 (!%p3837_p7), %v5491_v42, %v5491_v42  ;;  %3448 = vmatprep.subr.bf16.mxu0 (!%p3837_p7), %v4371_v14 }
 0x9e0   : > { %3313 = vadd.xlane.f32.xlu0 %v5491_v42 }
 0x9e1   : > { %3449 = vmatpush1.bf16.msra.mxu0 %v4373_v15 }
 0x9e2   : > { %3321 = vadd.xlane.f32.xlu1 %v3318_v34  ;;  %3450 = vmatprep.subr.bf16.mxu0 %v4374_v16 }
 0x9e5   : > { %3451 = vmatpush1.bf16.msra.mxu0 %v4376_v18 }
 0x9e6   : > { %3452 = vmatprep.subr.bf16.mxu0 %v4377_v7 }
 0x9e9   : > { %3453 = vmatpush1.bf16.msra.mxu0 %v4379_v13 }
 0x9ea   : > { %3454 = vmatprep.subr.bf16.mxu0 %v4380_v21 }
 0x9ed   : > { %3455 = vmatpush1.bf16.msra.mxu0 %v4382_v24 }
 0x9ee   : > { %3456 = vmatprep.subr.bf16.mxu0 %v4383_v53 }
 0x9f1   : > { %3457 = vmatpush1.bf16.msra.mxu0 %v4385_v26 }
 0x9f2   : > { %3458 = vmatprep.subr.bf16.mxu0 %v4386_v22 }
 0x9f5   : > { %3459 = vmatpush1.bf16.msra.mxu0 %v4388_v30 }
 0x9f6   : > { %3460 = vmatprep.subr.bf16.mxu0 %v4389_v28 }
 0x9f9   : > { %3461 = vmatpush1.bf16.msra.mxu0 %v4391_v31 }
 0xa69   : > { %v3312_v32 = vpop.xlane.xlu0 %3311 }
 0xa6a   : > { %v3315_v36 = vmul.f32 0.0078125, %v3312_v32 }
 0xa6b   : > { %v3320_v38 = vpop.xlane.xlu1 %3319 }
 0xa6c   : > { %v3325_v41 = vmul.f32 %v3315_v36, %v3315_v36  ;;  %v3323_v43 = vmul.f32 0.0078125, %v3320_v38  ;;  %v3329_v8 = vsub.f32 %v5487_v63, %v3315_v36 }
 0xa6d   : > { %v3314_v44 = vpop.xlane.xlu0 %3313 }
 0xa6e   : > { %v3327_v45 = vsub.f32 %v3323_v43, %v3325_v41  ;;  %v3316_v46 = vmul.f32 0.0078125, %v3314_v44 }
 0xa6f   : > { %v3322_v49 = vpop.xlane.xlu1 %3321 }
 0xa70   : > { %v3331_v50 = vadd.f32 1e-05, %v3327_v45  ;;  %v3326_v19 = vmul.f32 %v3316_v46, %v3316_v46  ;;  %v3324_v20 = vmul.f32 0.0078125, %v3322_v49  ;;  %v3330_v58 = vsub.f32 %v5491_v42, %v3316_v46 }
 0xa72   : > { %4392 = vrsqrt.f32 %v3331_v50  ;;  %v3328_v51 = vsub.f32 %v3324_v20, %v3326_v19 }
 0xa74   : > { %v3332_v52 = vadd.f32 1e-05, %v3328_v51 }
 0xa76   : > { %4394 = vrsqrt.f32 %v3332_v52 }
 0xa7c   : > { %v4393_v55 = vpop.eup %4392 }
 0xa7d   : > { %v3335_v56 = vmul.f32 %v4393_v55, %v3329_v8 }
 0xa7f   : > { %v3341_v17 = vmul.f32 %v3340_v57, %v3335_v56 }
 0xa80   : > { %v4395_v25 = vpop.eup %4394 }
 0xa81   : > { %v3336_v39 = vmul.f32 %v4395_v25, %v3330_v58  ;;  %v3347_v40 = vadd.f32 %v3346_v29, %v3341_v17 }
 0xa83   : > { %v3342_v6 = vmul.f32 %v3340_v57, %v3336_v39 }
 0xa85   : > { %v3348_v23 = vadd.f32 %v3346_v29, %v3342_v6 }
 0xa87   : > { %v3349_v60 = vpack.c.bf16 %v3348_v23, %v3347_v40 }
 0xa89   : > { %3479 = vmatmul.mubr.bf16.vlgmr.msra.gmra.mrb[0].mxu0 %v3349_v60 }
 0xb5c   : > { %v3480_v61 = vpop.f32.mrb[0].mxu0 }
 0xb5d   : > { %3489 = vst [vmem:[%s5020_s28] sm:$0xff] %v3480_v61  ;;  %v3482_v62 = vpop.f32.mrb[1].mxu0 }
 0xb5e   : > { %3490 = vst [vmem:[%s5020_s28 + $0x8] sm:$0xff] %v3482_v62  ;;  %v3484_v0 = vpop.f32.mrb[2].mxu0 }
 0xb5f   : > { %3491 = vst [vmem:[%s5020_s28 + $0x10] sm:$0xff] %v3484_v0  ;;  %v3486_v48 = vpop.f32.mrb[3].mxu0 }
 0xb60   : > { %3492 = vst [vmem:[%s5020_s28 + $0x18] sm:$0xff] %v3486_v48 }
 0xb61 PF: > { %s5663_s24 = sld [smem:[#allocation25_spill]]  ;;  %s3864_s23 = sshll.u32 %s4632_s20, 9 }
 0xb62   : > { %s5664_s6 = sld [smem:[#allocation35_spill]]  ;;  %s3508_s22 = sshll.u32 %s5020_s28, 4  ;;  %s5519_s22 = int_to_ptr.vmem [resolvable:$true] %s3508_s22 }
 0xb63   : > { %s5665_s30 = sand.u32 1, %s4608_s14   ;;  %s4514_s18 = scalar_lea.vmem %s5519_s22, 512 }
 0xb64   : > { %s5523_s5 = scalar_lea.sflag [#allocation5], %s5665_s30  ;;  %p4515_p0 = scmp.ne.s32.totalorder %s5519_s22, %s4514_s18 }
 0xb65   : > { %s4665_s20 = smov [#allocation11]  }
 0xb66   : > { %s4518_s8 = sshll.u32 %s4665_s20, 4  ;;  %s4519_s8 = int_to_ptr.vmem [resolvable:$false] %s4518_s8 }
 0xb67   : > { %p5666_p10 = scmp.ne.s32.totalorder %s5663_s24, 0  ;;  %s4520_s16 = scalar_lea.vmem %s4519_s8, 1024 }
 0xb68   : > { %s5516_s15 = scalar_lea.hbm %s5664_s6, %s3864_s23  ;;  %p4521_p4 = scmp.lt.s32.totalorder %s5519_s22, %s4519_s8 }
 0xb69   : > { %p4516_p13 = pnand %p4515_p0, %p5666_p10  ;;  %p4522_p5 = scmp.lt.s32.totalorder %s4520_s16, %s4514_s18 }
 0xb6b   : > { %p4517_p11 = pneg %p4516_p13  ;;  %p4523_p9 = por %p4522_p5, %p4521_p4 }
 0xb6d   : > { %p4524_p3 = pnand %p4523_p9, %p4517_p11 }
 0xb6f   : > { %4527 = shalt.err (!%p4524_p3)
}
 0xb70   : > { %s4528_s28 = scalar_lea.hbm %s5516_s15, 512  ;;  %s4532_s29 = scalar_lea.hbm %s5664_s6, 1024 }
 0xb71   : > { %p4529_p2 = scmp.ne.s32.totalorder %s5516_s15, %s4528_s28  ;;  %p4533_p12 = scmp.lt.u32.totalorder %s5516_s15, %s5664_s6 }
 0xb72   : > { %p4534_p1 = scmp.lt.u32.totalorder %s4532_s29, %s4528_s28  ;;  %p4536_p0 = scmp.lt.u32.totalorder %s4528_s28, %s5516_s15 }
 0xb73   : > { %p4530_p6 = pnand %p4529_p2, %p5666_p10 }
 0xb74   : > { %p4535_p7 = por %p4534_p1, %p4533_p12 }
 0xb75   : > { %p4531_p8 = pneg %p4530_p6 }
 0xb76   : > { %p4537_p13 = por %p4536_p0, %p4535_p7 }
 0xb78   : > { %p4538_p11 = pnand %p4537_p13, %p4531_p8 }
 0xb7a   : > { %4541 = shalt.err (!%p4538_p11)
}
 0xb7b   : > { %s4666_s13 = smov 256   ;;  %s4667_s27 = smov 16  }
 0xb7c   : > { %4044 = dma.vmem_to_hbm [thread:$0]  (%p5666_p10), %s5519_s22, 512, %s5516_s15, %s5523_s5, %s4666_s13, %s4666_s13, %s4667_s27  }
 0xb7d PF: > { %s5667_s26 = sld [smem:[#allocation20_spill]]  ;;  %s5668_s7 = sld [smem:[#allocation16_spill]] }
 0xb7e   : > { %s5669_s19 = sld [smem:[#allocation26_spill]] }
 0xb83   : > { %p4067_p4 = scmp.ge.s32.totalorder %s5667_s26, 2  ;;  %s3523_s4 = sand.u32 1, %s5668_s7  }
 0xb84   : > { %p5670_p5 = scmp.ne.s32.totalorder %s5669_s19, 0  ;;  %s3524_s23 = scalar_lea.sflag [#allocation5], %s3523_s4 }
 0xb86   : > { %p4061_p9 = pnand %p4067_p4, %p5670_p5 }
 0xb88   : > { %4599 = dma.done.wait (!%p4061_p9), %s3524_s23, 512  }
 0xb89   : > { %4601 = vsyncadd (!%p4061_p9), %s3524_s23, 4294966784  ;;  %s30_s23 = sadd.s32 1, %s5667_s26   ;;  %s5671_s1 = sld [smem:[#allocation17_spill]] }
 0xb8a   : > { %p27_p3 = scmp.ge.s32.totalorder %s30_s23, 6   ;;  %s5672_s15 = sld [smem:[#allocation24_spill]] }
 0xb8b   : > { %s5673_s24 = sld [smem:[#allocation18_spill]]  ;;  %s5674_s18 = sld [smem:[#allocation23_spill]] }
 0xb8c   : > { %s5675_s20 = sld [smem:[#allocation19_spill]]  ;;  %s5676_s11 = sld [smem:[#allocation21_spill]] }
 0xb8d   : > { %s5677_s22 = sld [smem:[#allocation22_spill]]  ;;  %s5678_s13 = smov %s4608_s14 }
 0xb8e   : > { %s5680_s16 = smov %s4620_s17  ;;  %s5682_s19 = smov %s4636_s21 }
 0xb8f   : > { %s5679_s14 = smov %s5671_s1  ;;  %29 = sbr.rel (!%p27_p3) target bundleno = 22 (0x16), region = 153 }
 0xb91   : > { %s5681_s17 = smov %s5673_s24 }
 0xb92   : > { %s5683_s21 = smov %s5676_s11 }
 0xb96   :  { %3529 = vsyncpa [#allocation4], 1 }
 0xb97   :  { %3531 = vsyncpa [#allocation4 + $0x1], 1 }
 0xb98   :  { %3532 = vsyncpa [#allocation7], 1 }
 0xb99   :  { %3534 = vsyncpa [#allocation7 + $0x1], 1 }
 0xb9a   :  { %3535 = vsyncpa [#allocation10], 1 }
 0xb9b   :  { %3536 = vsyncpa [#allocation5], 1 }
 0xb9c   :  { %3538 = vsyncpa [#allocation5 + $0x1], 1 }

</bundles_post_ra>
